<compile_context>
chip_gen: v6e
topology: v6e:2x2x1
jax: 0.10.0
libtpu: 0.0.40
codegen_flags: <defaults>
</compile_context>

<pallas_src>
import functools

import jax
import jax.numpy as jnp
from jax import lax
from jax.experimental import pallas as pl
from jax.experimental.pallas import tpu as pltpu

INPUT_SIZE = 1
HIDDEN = 32
NUM_LAYERS = 2
OUTPUT_SIZE = 1


def lstm_model_kernel(seq, batch_pad,
                      x_ref, w1_ref, b1_ref,
                      wih0_ref, whh0_ref, bg0_ref,
                      wih1_ref, whh1_ref, bg1_ref,
                      w2h0_ref, w2h1_ref, b2_ref, out_ref):
    """Whole forward pass, fully resident in VMEM (working set ~100 KiB).

    x_ref     : (seq*batch_pad, 1)  f32   time-major, batch padded to mult. of 8
    w1_ref    : (1, H)              f32   linear_1 weight row (input_size == 1)
    b1_ref    : (1, H)              f32
    wih0_ref  : (H, 4H)             f32   weight_ih_l0^T  (gate order i|f|g|o)
    whh0_ref  : (H, 4H)             f32   weight_hh_l0^T
    bg0_ref   : (1, 4H)             f32   b_ih_l0 + b_hh_l0
    wih1_ref  : (H, 4H)             f32   weight_ih_l1^T
    whh1_ref  : (H, 4H)             f32   weight_hh_l1^T
    bg1_ref   : (1, 4H)             f32   b_ih_l1 + b_hh_l1
    w2h0_ref  : (1, H)              f32   linear_2 last row, columns [0:H]
    w2h1_ref  : (1, H)              f32   linear_2 last row, columns [H:2H]
    b2_ref    : (1, 1)              f32
    out_ref   : (batch_pad, 1)      f32
    """
    H = HIDDEN
    H4 = 4 * H
    bp = batch_pad

    # ---- hoisted, non-recurrent work -------------------------------------
    # linear_1 (K=1) as a VPU outer product + ReLU, for every timestep at once.
    x_flat = x_ref[...]                                          # (seq*bp, 1)
    z = jnp.maximum(x_flat * w1_ref[...] + b1_ref[...], 0.0)     # (seq*bp, H)

    # Layer-0 input-side gate pre-activations for ALL timesteps in one MXU
    # matmul; layer-0 gate bias folded in here.
    zg = jnp.dot(z, wih0_ref[...],
                 preferred_element_type=jnp.float32,
                 precision=lax.Precision.DEFAULT) + bg0_ref[...]  # (seq*bp, 4H)

    whh0 = whh0_ref[...]                                         # (H, 4H)
    wih1 = wih1_ref[...]                                         # (H, 4H)
    whh1 = whh1_ref[...]                                         # (H, 4H)
    # Hoisted bias broadcast (JAX does not CSE broadcast_in_dim inside loops).
    bg1_b = jnp.broadcast_to(bg1_ref[...], (bp, H4))

    # Lane mask selecting the g gate; lets us get tanh from the same single
    # full-vreg sigmoid pass:  tanh(x) = 2*sigmoid(2x) - 1.
    lane = lax.broadcasted_iota(jnp.int32, (bp, H4), 1)
    g_mask = (lane >= 2 * H) & (lane < 3 * H)

    def cell(gates, c):
        pre = jnp.where(g_mask, gates + gates, gates)            # 2x on g lanes
        s = jax.nn.sigmoid(pre)                                  # ONE EUP push / 4H lanes
        act = jnp.where(g_mask, s + s - 1.0, s)                  # tanh on g lanes
        i = act[:, 0:H]
        f = act[:, H:2 * H]
        g = act[:, 2 * H:3 * H]
        o = act[:, 3 * H:4 * H]
        c_new = f * c + i * g
        h_new = o * jnp.tanh(c_new)
        return h_new, c_new

    zeros = jnp.zeros((bp, H), jnp.float32)
    h0, c0, h1, c1 = zeros, zeros, zeros, zeros

    # ---- recurrence: fully unrolled (seq static at trace time) ------------
    # Static unroll keeps every slice static + sublane-aligned (offset t*bp is
    # a multiple of 8) and gives the scheduler full visibility to overlap
    # layer-1 of step t with layer-0 of step t+1.
    for t in range(seq):
        off = t * bp                                             # multiple of 8
        zg_t = zg[off:off + bp, :]                               # aligned free view
        gates0 = zg_t + jnp.dot(h0, whh0,
                                preferred_element_type=jnp.float32,
                                precision=lax.Precision.DEFAULT)
        h0, c0 = cell(gates0, c0)
        # Layer 1: two accumulating dots (no per-step lane concat of [h0|h1]).
        gates1 = (jnp.dot(h0, wih1,
                          preferred_element_type=jnp.float32,
                          precision=lax.Precision.DEFAULT)
                  + jnp.dot(h1, whh1,
                            preferred_element_type=jnp.float32,
                            precision=lax.Precision.DEFAULT)
                  + bg1_b)
        h1, c1 = cell(gates1, c1)

    # ---- head --------------------------------------------------------------
    # h_n.permute(1,0,2).reshape(batch,-1) == [h0_final | h1_final];
    # predictions[:, -1] only needs the last row of linear_2 -> VPU multiply +
    # XLU reduce; the row arrives pre-split so no in-kernel lane-offset slice.
    # TODO(synk): training-mode dropout (p=0.2) before linear_2 not implemented;
    # kernel matches the PyTorch module in eval mode.
    pred = jnp.sum(h0 * w2h0_ref[...] + h1 * w2h1_ref[...],
                   axis=-1, keepdims=True) + b2_ref[...]         # (bp, 1)
    out_ref[...] = pred


def lstm_model_forward(x, params):
    """x: (batch, seq, input_size) float32  ->  (batch,) float32."""
    batch, seq, in_sz = x.shape
    assert in_sz == INPUT_SIZE == 1

    # Pad batch to a multiple of 8 sublanes: per-step matmul/VPU/EUP cost is
    # identical up to the MXU row count, and it makes every per-timestep slice
    # of the hoisted gate table tile-aligned.
    bp = max(8, ((batch + 7) // 8) * 8)

    # batch_first -> time-major; pad batch; flatten to (seq*bp, 1) so the
    # hoisted projection in the kernel is one dense matmul, no in-kernel reshape.
    x_tm = jnp.transpose(x, (1, 0, 2)).astype(jnp.float32)       # (seq, batch, 1)
    if bp != batch:
        x_tm = jnp.pad(x_tm, ((0, 0), (0, bp - batch), (0, 0)))
    x_flat = x_tm.reshape(seq * bp, INPUT_SIZE)

    vmem = pl.BlockSpec(memory_space=pltpu.MemorySpace.VMEM)
    kernel = functools.partial(lstm_model_kernel, seq, bp)

    out = pl.pallas_call(
        kernel,
        out_shape=jax.ShapeDtypeStruct((bp, 1), jnp.float32),
        in_specs=[vmem] * 12,
        out_specs=vmem,
    )(x_flat,
      params["w1_row"], params["b1"],
      params["wih0_t"], params["whh0_t"], params["bg0"],
      params["wih1_t"], params["whh1_t"], params["bg1"],
      params["w2_h0"], params["w2_h1"], params["b2"])

    return out[:batch, 0]


def lstm_model_reference(x, params):
    """Pure-JAX reference of the same eval-mode forward (for tolerance check)."""
    batch, seq, _ = x.shape
    H = HIDDEN
    z = jnp.maximum(x.astype(jnp.float32) * params["w1_row"][0]
                    + params["b1"][0], 0.0)                      # (batch, seq, H)

    def cell(h, c, gates):
        i = jax.nn.sigmoid(gates[:, 0:H])
        f = jax.nn.sigmoid(gates[:, H:2 * H])
        g = jnp.tanh(gates[:, 2 * H:3 * H])
        o = jax.nn.sigmoid(gates[:, 3 * H:4 * H])
        c_new = f * c + i * g
        return o * jnp.tanh(c_new), c_new

    zeros = jnp.zeros((batch, H), jnp.float32)
    h0, c0, h1, c1 = zeros, zeros, zeros, zeros
    for t in range(seq):
        g0 = (z[:, t, :] @ params["wih0_t"] + h0 @ params["whh0_t"]
              + params["bg0"][0])
        h0, c0 = cell(h0, c0, g0)
        g1 = (h0 @ params["wih1_t"] + h1 @ params["whh1_t"] + params["bg1"][0])
        h1, c1 = cell(h1, c1, g1)
    pred = (jnp.sum(h0 * params["w2_h0"][0] + h1 * params["w2_h1"][0], axis=-1)
            + params["b2"][0, 0])
    return pred


def _orthogonal(key, rows, cols):
    a = jax.random.normal(key, (rows, cols), jnp.float32)
    q, r = jnp.linalg.qr(a)
    d = jnp.sign(jnp.diagonal(r))
    return q * d[None, :]


def init_params(key):
    keys = jax.random.split(key, 8)
    H, L = HIDDEN, NUM_LAYERS

    # linear_1: in=INPUT_SIZE, out=H (PyTorch default uniform init)
    bound1 = 1.0 / jnp.sqrt(INPUT_SIZE)
    w1 = jax.random.uniform(keys[0], (H, INPUT_SIZE), jnp.float32, -bound1, bound1)
    b1 = jax.random.uniform(keys[1], (H,), jnp.float32, -bound1, bound1)

    # LSTM: weight_ih kaiming-normal, weight_hh orthogonal, biases zero
    std_ih = jnp.sqrt(2.0 / H)           # fan_in = H (input already projected)
    wih0 = std_ih * jax.random.normal(keys[2], (4 * H, H), jnp.float32)
    wih1 = std_ih * jax.random.normal(keys[3], (4 * H, H), jnp.float32)
    whh0 = _orthogonal(keys[4], 4 * H, H)
    whh1 = _orthogonal(keys[5], 4 * H, H)

    # linear_2: in=L*H, out=OUTPUT_SIZE (PyTorch default uniform init)
    bound2 = 1.0 / jnp.sqrt(L * H)
    w2 = jax.random.uniform(keys[6], (OUTPUT_SIZE, L * H), jnp.float32, -bound2, bound2)
    b2 = jax.random.uniform(keys[7], (OUTPUT_SIZE,), jnp.float32, -bound2, bound2)

    w2_last = w2[OUTPUT_SIZE - 1:OUTPUT_SIZE, :]                 # (1, 2H)
    return {
        "w1_row": jnp.transpose(w1).reshape(1, H),               # (1, H)
        "b1": b1.reshape(1, H),                                  # (1, H)
        "wih0_t": jnp.transpose(wih0),                           # (H, 4H)
        "whh0_t": jnp.transpose(whh0),                           # (H, 4H)
        "bg0": jnp.zeros((1, 4 * H), jnp.float32),               # b_ih_l0 + b_hh_l0
        "wih1_t": jnp.transpose(wih1),                           # (H, 4H)
        "whh1_t": jnp.transpose(whh1),                           # (H, 4H)
        "bg1": jnp.zeros((1, 4 * H), jnp.float32),               # b_ih_l1 + b_hh_l1
        "w2_h0": w2_last[:, :H],                                 # (1, H)
        "w2_h1": w2_last[:, H:2 * H],                            # (1, H)
        "b2": b2[OUTPUT_SIZE - 1:].reshape(1, 1),                # (1, 1)
    }


if __name__ == "__main__":
    key = jax.random.PRNGKey(0)
    pkey, xkey = jax.random.split(key)

    params = init_params(pkey)

    batch, seq = 2, 8
    x = jax.random.normal(xkey, (batch, seq, INPUT_SIZE), jnp.float32)

    preds = lstm_model_forward(x, params)
    jax.block_until_ready(preds)
    assert preds.shape == (batch,)

    ref = lstm_model_reference(x, params)
    # MXU uses single-pass bf16 for f32 dots -> tolerance, not bitwise, match.
    assert jnp.allclose(preds, ref, atol=2e-2, rtol=2e-2)

    print("KERNEL_OK")
</pallas_src>

<mosaic_0001>
module attributes {stable_mosaic.version = 11 : i64} {
  func.func @lstm_model_kernel(%arg0: memref<64x1xf32, #tpu.memory_space<vmem>>, %arg1: memref<1x32xf32, #tpu.memory_space<vmem>>, %arg2: memref<1x32xf32, #tpu.memory_space<vmem>>, %arg3: memref<32x128xf32, #tpu.memory_space<vmem>>, %arg4: memref<32x128xf32, #tpu.memory_space<vmem>>, %arg5: memref<1x128xf32, #tpu.memory_space<vmem>>, %arg6: memref<32x128xf32, #tpu.memory_space<vmem>>, %arg7: memref<32x128xf32, #tpu.memory_space<vmem>>, %arg8: memref<1x128xf32, #tpu.memory_space<vmem>>, %arg9: memref<1x32xf32, #tpu.memory_space<vmem>>, %arg10: memref<1x32xf32, #tpu.memory_space<vmem>>, %arg11: memref<1x1xf32, #tpu.memory_space<vmem>>, %arg12: memref<8x1xf32, #tpu.memory_space<vmem>>) attributes {dimension_semantics = [], scalar_prefetch = 0 : i64, scratch_operands = 0 : i64, tpu.core_type = #tpu.core_type<tc>} {
    %c0 = arith.constant 0 : index
    %c0_0 = arith.constant 0 : index
    %0 = vector.load %arg0[%c0, %c0_0] : memref<64x1xf32, #tpu.memory_space<vmem>>, vector<64x1xf32>
    %c0_1 = arith.constant 0 : index
    %c0_2 = arith.constant 0 : index
    %1 = vector.load %arg1[%c0_1, %c0_2] : memref<1x32xf32, #tpu.memory_space<vmem>>, vector<1x32xf32>
    %2 = vector.broadcast %0 : vector<64x1xf32> to vector<64x32xf32>
    %3 = vector.broadcast %1 : vector<1x32xf32> to vector<64x32xf32>
    %4 = arith.mulf %2, %3 : vector<64x32xf32>
    %c0_3 = arith.constant 0 : index
    %c0_4 = arith.constant 0 : index
    %5 = vector.load %arg2[%c0_3, %c0_4] : memref<1x32xf32, #tpu.memory_space<vmem>>, vector<1x32xf32>
    %6 = vector.broadcast %5 : vector<1x32xf32> to vector<64x32xf32>
    %7 = arith.addf %4, %6 : vector<64x32xf32>
    %cst = arith.constant 0.000000e+00 : f32
    %8 = vector.broadcast %cst : f32 to vector<64x32xf32>
    %9 = arith.maximumf %7, %8 : vector<64x32xf32>
    %c0_5 = arith.constant 0 : index
    %c0_6 = arith.constant 0 : index
    %10 = vector.load %arg3[%c0_5, %c0_6] : memref<32x128xf32, #tpu.memory_space<vmem>>, vector<32x128xf32>
    %cst_7 = arith.constant dense<0.000000e+00> : vector<64x128xf32>
    %11 = tpu.matmul %9, %10, %cst_7 {dimension_numbers = #tpu.dot_dimension_numbers<[1], [0], [0], [1], [0, 0, 1, 1], [], []>} : vector<64x32xf32>, vector<32x128xf32>, vector<64x128xf32> -> vector<64x128xf32>
    %c0_8 = arith.constant 0 : index
    %c0_9 = arith.constant 0 : index
    %12 = vector.load %arg5[%c0_8, %c0_9] : memref<1x128xf32, #tpu.memory_space<vmem>>, vector<1x128xf32>
    %13 = vector.broadcast %12 : vector<1x128xf32> to vector<64x128xf32>
    %14 = arith.addf %11, %13 : vector<64x128xf32>
    %c0_10 = arith.constant 0 : index
    %c0_11 = arith.constant 0 : index
    %15 = vector.load %arg4[%c0_10, %c0_11] : memref<32x128xf32, #tpu.memory_space<vmem>>, vector<32x128xf32>
    %c0_12 = arith.constant 0 : index
    %c0_13 = arith.constant 0 : index
    %16 = vector.load %arg6[%c0_12, %c0_13] : memref<32x128xf32, #tpu.memory_space<vmem>>, vector<32x128xf32>
    %c0_14 = arith.constant 0 : index
    %c0_15 = arith.constant 0 : index
    %17 = vector.load %arg7[%c0_14, %c0_15] : memref<32x128xf32, #tpu.memory_space<vmem>>, vector<32x128xf32>
    %c0_16 = arith.constant 0 : index
    %c0_17 = arith.constant 0 : index
    %18 = vector.load %arg8[%c0_16, %c0_17] : memref<1x128xf32, #tpu.memory_space<vmem>>, vector<1x128xf32>
    %19 = vector.shape_cast %18 : vector<1x128xf32> to vector<1x128xf32>
    %20 = vector.broadcast %19 : vector<1x128xf32> to vector<8x128xf32>
    %21 = tpu.iota {dimensions = array<i32: 1>} : vector<8x128xi32>
    %c64_i32 = arith.constant 64 : i32
    %22 = vector.broadcast %c64_i32 : i32 to vector<8x128xi32>
    %23 = arith.cmpi sge, %21, %22 : vector<8x128xi32>
    %c96_i32 = arith.constant 96 : i32
    %24 = vector.broadcast %c96_i32 : i32 to vector<8x128xi32>
    %25 = arith.cmpi slt, %21, %24 : vector<8x128xi32>
    %26 = arith.andi %23, %25 : vector<8x128xi1>
    %cst_18 = arith.constant 0.000000e+00 : f32
    %27 = vector.broadcast %cst_18 : f32 to vector<8x32xf32>
    %28 = vector.extract_strided_slice %14 {offsets = [0, 0], sizes = [8, 128], strides = [1, 1]} : vector<64x128xf32> to vector<8x128xf32>
    %cst_19 = arith.constant dense<0.000000e+00> : vector<8x128xf32>
    %29 = tpu.matmul %27, %15, %cst_19 {dimension_numbers = #tpu.dot_dimension_numbers<[1], [0], [0], [1], [0, 0, 1, 1], [], []>} : vector<8x32xf32>, vector<32x128xf32>, vector<8x128xf32> -> vector<8x128xf32>
    %30 = arith.addf %28, %29 : vector<8x128xf32>
    %31 = arith.addf %30, %30 : vector<8x128xf32>
    %32 = arith.select %26, %31, %30 : vector<8x128xi1>, vector<8x128xf32>
    %33 = arith.negf %32 : vector<8x128xf32>
    %34 = math.exp %33 : vector<8x128xf32>
    %cst_20 = arith.constant 1.000000e+00 : f32
    %35 = vector.broadcast %cst_20 : f32 to vector<8x128xf32>
    %36 = arith.addf %35, %34 : vector<8x128xf32>
    %37 = arith.divf %35, %36 : vector<8x128xf32>
    %38 = arith.addf %37, %37 : vector<8x128xf32>
    %cst_21 = arith.constant 1.000000e+00 : f32
    %39 = vector.broadcast %cst_21 : f32 to vector<8x128xf32>
    %40 = arith.subf %38, %39 : vector<8x128xf32>
    %41 = arith.select %26, %40, %37 : vector<8x128xi1>, vector<8x128xf32>
    %42 = vector.extract_strided_slice %41 {offsets = [0, 0], sizes = [8, 32], strides = [1, 1]} : vector<8x128xf32> to vector<8x32xf32>
    %43 = vector.extract_strided_slice %41 {offsets = [0, 32], sizes = [8, 32], strides = [1, 1]} : vector<8x128xf32> to vector<8x32xf32>
    %44 = vector.extract_strided_slice %41 {offsets = [0, 64], sizes = [8, 32], strides = [1, 1]} : vector<8x128xf32> to vector<8x32xf32>
    %45 = vector.extract_strided_slice %41 {offsets = [0, 96], sizes = [8, 32], strides = [1, 1]} : vector<8x128xf32> to vector<8x32xf32>
    %46 = arith.mulf %43, %27 : vector<8x32xf32>
    %47 = arith.mulf %42, %44 : vector<8x32xf32>
    %48 = arith.addf %46, %47 : vector<8x32xf32>
    %49 = math.tanh %48 : vector<8x32xf32>
    %50 = arith.mulf %45, %49 : vector<8x32xf32>
    %cst_22 = arith.constant dense<0.000000e+00> : vector<8x128xf32>
    %51 = tpu.matmul %50, %16, %cst_22 {dimension_numbers = #tpu.dot_dimension_numbers<[1], [0], [0], [1], [0, 0, 1, 1], [], []>} : vector<8x32xf32>, vector<32x128xf32>, vector<8x128xf32> -> vector<8x128xf32>
    %cst_23 = arith.constant dense<0.000000e+00> : vector<8x128xf32>
    %52 = tpu.matmul %27, %17, %cst_23 {dimension_numbers = #tpu.dot_dimension_numbers<[1], [0], [0], [1], [0, 0, 1, 1], [], []>} : vector<8x32xf32>, vector<32x128xf32>, vector<8x128xf32> -> vector<8x128xf32>
    %53 = arith.addf %51, %52 : vector<8x128xf32>
    %54 = arith.addf %53, %20 : vector<8x128xf32>
    %55 = arith.addf %54, %54 : vector<8x128xf32>
    %56 = arith.select %26, %55, %54 : vector<8x128xi1>, vector<8x128xf32>
    %57 = arith.negf %56 : vector<8x128xf32>
    %58 = math.exp %57 : vector<8x128xf32>
    %cst_24 = arith.constant 1.000000e+00 : f32
    %59 = vector.broadcast %cst_24 : f32 to vector<8x128xf32>
    %60 = arith.addf %59, %58 : vector<8x128xf32>
    %61 = arith.divf %59, %60 : vector<8x128xf32>
    %62 = arith.addf %61, %61 : vector<8x128xf32>
    %cst_25 = arith.constant 1.000000e+00 : f32
    %63 = vector.broadcast %cst_25 : f32 to vector<8x128xf32>
    %64 = arith.subf %62, %63 : vector<8x128xf32>
    %65 = arith.select %26, %64, %61 : vector<8x128xi1>, vector<8x128xf32>
    %66 = vector.extract_strided_slice %65 {offsets = [0, 0], sizes = [8, 32], strides = [1, 1]} : vector<8x128xf32> to vector<8x32xf32>
    %67 = vector.extract_strided_slice %65 {offsets = [0, 32], sizes = [8, 32], strides = [1, 1]} : vector<8x128xf32> to vector<8x32xf32>
    %68 = vector.extract_strided_slice %65 {offsets = [0, 64], sizes = [8, 32], strides = [1, 1]} : vector<8x128xf32> to vector<8x32xf32>
    %69 = vector.extract_strided_slice %65 {offsets = [0, 96], sizes = [8, 32], strides = [1, 1]} : vector<8x128xf32> to vector<8x32xf32>
    %70 = arith.mulf %67, %27 : vector<8x32xf32>
    %71 = arith.mulf %66, %68 : vector<8x32xf32>
    %72 = arith.addf %70, %71 : vector<8x32xf32>
    %73 = math.tanh %72 : vector<8x32xf32>
    %74 = arith.mulf %69, %73 : vector<8x32xf32>
    %75 = vector.extract_strided_slice %14 {offsets = [8, 0], sizes = [8, 128], strides = [1, 1]} : vector<64x128xf32> to vector<8x128xf32>
    %cst_26 = arith.constant dense<0.000000e+00> : vector<8x128xf32>
    %76 = tpu.matmul %50, %15, %cst_26 {dimension_numbers = #tpu.dot_dimension_numbers<[1], [0], [0], [1], [0, 0, 1, 1], [], []>} : vector<8x32xf32>, vector<32x128xf32>, vector<8x128xf32> -> vector<8x128xf32>
    %77 = arith.addf %75, %76 : vector<8x128xf32>
    %78 = arith.addf %77, %77 : vector<8x128xf32>
    %79 = arith.select %26, %78, %77 : vector<8x128xi1>, vector<8x128xf32>
    %80 = arith.negf %79 : vector<8x128xf32>
    %81 = math.exp %80 : vector<8x128xf32>
    %cst_27 = arith.constant 1.000000e+00 : f32
    %82 = vector.broadcast %cst_27 : f32 to vector<8x128xf32>
    %83 = arith.addf %82, %81 : vector<8x128xf32>
    %84 = arith.divf %82, %83 : vector<8x128xf32>
    %85 = arith.addf %84, %84 : vector<8x128xf32>
    %cst_28 = arith.constant 1.000000e+00 : f32
    %86 = vector.broadcast %cst_28 : f32 to vector<8x128xf32>
    %87 = arith.subf %85, %86 : vector<8x128xf32>
    %88 = arith.select %26, %87, %84 : vector<8x128xi1>, vector<8x128xf32>
    %89 = vector.extract_strided_slice %88 {offsets = [0, 0], sizes = [8, 32], strides = [1, 1]} : vector<8x128xf32> to vector<8x32xf32>
    %90 = vector.extract_strided_slice %88 {offsets = [0, 32], sizes = [8, 32], strides = [1, 1]} : vector<8x128xf32> to vector<8x32xf32>
    %91 = vector.extract_strided_slice %88 {offsets = [0, 64], sizes = [8, 32], strides = [1, 1]} : vector<8x128xf32> to vector<8x32xf32>
    %92 = vector.extract_strided_slice %88 {offsets = [0, 96], sizes = [8, 32], strides = [1, 1]} : vector<8x128xf32> to vector<8x32xf32>
    %93 = arith.mulf %90, %48 : vector<8x32xf32>
    %94 = arith.mulf %89, %91 : vector<8x32xf32>
    %95 = arith.addf %93, %94 : vector<8x32xf32>
    %96 = math.tanh %95 : vector<8x32xf32>
    %97 = arith.mulf %92, %96 : vector<8x32xf32>
    %cst_29 = arith.constant dense<0.000000e+00> : vector<8x128xf32>
    %98 = tpu.matmul %97, %16, %cst_29 {dimension_numbers = #tpu.dot_dimension_numbers<[1], [0], [0], [1], [0, 0, 1, 1], [], []>} : vector<8x32xf32>, vector<32x128xf32>, vector<8x128xf32> -> vector<8x128xf32>
    %cst_30 = arith.constant dense<0.000000e+00> : vector<8x128xf32>
    %99 = tpu.matmul %74, %17, %cst_30 {dimension_numbers = #tpu.dot_dimension_numbers<[1], [0], [0], [1], [0, 0, 1, 1], [], []>} : vector<8x32xf32>, vector<32x128xf32>, vector<8x128xf32> -> vector<8x128xf32>
    %100 = arith.addf %98, %99 : vector<8x128xf32>
    %101 = arith.addf %100, %20 : vector<8x128xf32>
    %102 = arith.addf %101, %101 : vector<8x128xf32>
    %103 = arith.select %26, %102, %101 : vector<8x128xi1>, vector<8x128xf32>
    %104 = arith.negf %103 : vector<8x128xf32>
    %105 = math.exp %104 : vector<8x128xf32>
    %cst_31 = arith.constant 1.000000e+00 : f32
    %106 = vector.broadcast %cst_31 : f32 to vector<8x128xf32>
    %107 = arith.addf %106, %105 : vector<8x128xf32>
    %108 = arith.divf %106, %107 : vector<8x128xf32>
    %109 = arith.addf %108, %108 : vector<8x128xf32>
    %cst_32 = arith.constant 1.000000e+00 : f32
    %110 = vector.broadcast %cst_32 : f32 to vector<8x128xf32>
    %111 = arith.subf %109, %110 : vector<8x128xf32>
    %112 = arith.select %26, %111, %108 : vector<8x128xi1>, vector<8x128xf32>
    %113 = vector.extract_strided_slice %112 {offsets = [0, 0], sizes = [8, 32], strides = [1, 1]} : vector<8x128xf32> to vector<8x32xf32>
    %114 = vector.extract_strided_slice %112 {offsets = [0, 32], sizes = [8, 32], strides = [1, 1]} : vector<8x128xf32> to vector<8x32xf32>
    %115 = vector.extract_strided_slice %112 {offsets = [0, 64], sizes = [8, 32], strides = [1, 1]} : vector<8x128xf32> to vector<8x32xf32>
    %116 = vector.extract_strided_slice %112 {offsets = [0, 96], sizes = [8, 32], strides = [1, 1]} : vector<8x128xf32> to vector<8x32xf32>
    %117 = arith.mulf %114, %72 : vector<8x32xf32>
    %118 = arith.mulf %113, %115 : vector<8x32xf32>
    %119 = arith.addf %117, %118 : vector<8x32xf32>
    %120 = math.tanh %119 : vector<8x32xf32>
    %121 = arith.mulf %116, %120 : vector<8x32xf32>
    %122 = vector.extract_strided_slice %14 {offsets = [16, 0], sizes = [8, 128], strides = [1, 1]} : vector<64x128xf32> to vector<8x128xf32>
    %cst_33 = arith.constant dense<0.000000e+00> : vector<8x128xf32>
    %123 = tpu.matmul %97, %15, %cst_33 {dimension_numbers = #tpu.dot_dimension_numbers<[1], [0], [0], [1], [0, 0, 1, 1], [], []>} : vector<8x32xf32>, vector<32x128xf32>, vector<8x128xf32> -> vector<8x128xf32>
    %124 = arith.addf %122, %123 : vector<8x128xf32>
    %125 = arith.addf %124, %124 : vector<8x128xf32>
    %126 = arith.select %26, %125, %124 : vector<8x128xi1>, vector<8x128xf32>
    %127 = arith.negf %126 : vector<8x128xf32>
    %128 = math.exp %127 : vector<8x128xf32>
    %cst_34 = arith.constant 1.000000e+00 : f32
    %129 = vector.broadcast %cst_34 : f32 to vector<8x128xf32>
    %130 = arith.addf %129, %128 : vector<8x128xf32>
    %131 = arith.divf %129, %130 : vector<8x128xf32>
    %132 = arith.addf %131, %131 : vector<8x128xf32>
    %cst_35 = arith.constant 1.000000e+00 : f32
    %133 = vector.broadcast %cst_35 : f32 to vector<8x128xf32>
    %134 = arith.subf %132, %133 : vector<8x128xf32>
    %135 = arith.select %26, %134, %131 : vector<8x128xi1>, vector<8x128xf32>
    %136 = vector.extract_strided_slice %135 {offsets = [0, 0], sizes = [8, 32], strides = [1, 1]} : vector<8x128xf32> to vector<8x32xf32>
    %137 = vector.extract_strided_slice %135 {offsets = [0, 32], sizes = [8, 32], strides = [1, 1]} : vector<8x128xf32> to vector<8x32xf32>
    %138 = vector.extract_strided_slice %135 {offsets = [0, 64], sizes = [8, 32], strides = [1, 1]} : vector<8x128xf32> to vector<8x32xf32>
    %139 = vector.extract_strided_slice %135 {offsets = [0, 96], sizes = [8, 32], strides = [1, 1]} : vector<8x128xf32> to vector<8x32xf32>
    %140 = arith.mulf %137, %95 : vector<8x32xf32>
    %141 = arith.mulf %136, %138 : vector<8x32xf32>
    %142 = arith.addf %140, %141 : vector<8x32xf32>
    %143 = math.tanh %142 : vector<8x32xf32>
    %144 = arith.mulf %139, %143 : vector<8x32xf32>
    %cst_36 = arith.constant dense<0.000000e+00> : vector<8x128xf32>
    %145 = tpu.matmul %144, %16, %cst_36 {dimension_numbers = #tpu.dot_dimension_numbers<[1], [0], [0], [1], [0, 0, 1, 1], [], []>} : vector<8x32xf32>, vector<32x128xf32>, vector<8x128xf32> -> vector<8x128xf32>
    %cst_37 = arith.constant dense<0.000000e+00> : vector<8x128xf32>
    %146 = tpu.matmul %121, %17, %cst_37 {dimension_numbers = #tpu.dot_dimension_numbers<[1], [0], [0], [1], [0, 0, 1, 1], [], []>} : vector<8x32xf32>, vector<32x128xf32>, vector<8x128xf32> -> vector<8x128xf32>
    %147 = arith.addf %145, %146 : vector<8x128xf32>
    %148 = arith.addf %147, %20 : vector<8x128xf32>
    %149 = arith.addf %148, %148 : vector<8x128xf32>
    %150 = arith.select %26, %149, %148 : vector<8x128xi1>, vector<8x128xf32>
    %151 = arith.negf %150 : vector<8x128xf32>
    %152 = math.exp %151 : vector<8x128xf32>
    %cst_38 = arith.constant 1.000000e+00 : f32
    %153 = vector.broadcast %cst_38 : f32 to vector<8x128xf32>
    %154 = arith.addf %153, %152 : vector<8x128xf32>
    %155 = arith.divf %153, %154 : vector<8x128xf32>
    %156 = arith.addf %155, %155 : vector<8x128xf32>
    %cst_39 = arith.constant 1.000000e+00 : f32
    %157 = vector.broadcast %cst_39 : f32 to vector<8x128xf32>
    %158 = arith.subf %156, %157 : vector<8x128xf32>
    %159 = arith.select %26, %158, %155 : vector<8x128xi1>, vector<8x128xf32>
    %160 = vector.extract_strided_slice %159 {offsets = [0, 0], sizes = [8, 32], strides = [1, 1]} : vector<8x128xf32> to vector<8x32xf32>
    %161 = vector.extract_strided_slice %159 {offsets = [0, 32], sizes = [8, 32], strides = [1, 1]} : vector<8x128xf32> to vector<8x32xf32>
    %162 = vector.extract_strided_slice %159 {offsets = [0, 64], sizes = [8, 32], strides = [1, 1]} : vector<8x128xf32> to vector<8x32xf32>
    %163 = vector.extract_strided_slice %159 {offsets = [0, 96], sizes = [8, 32], strides = [1, 1]} : vector<8x128xf32> to vector<8x32xf32>
    %164 = arith.mulf %161, %119 : vector<8x32xf32>
    %165 = arith.mulf %160, %162 : vector<8x32xf32>
    %166 = arith.addf %164, %165 : vector<8x32xf32>
    %167 = math.tanh %166 : vector<8x32xf32>
    %168 = arith.mulf %163, %167 : vector<8x32xf32>
    %169 = vector.extract_strided_slice %14 {offsets = [24, 0], sizes = [8, 128], strides = [1, 1]} : vector<64x128xf32> to vector<8x128xf32>
    %cst_40 = arith.constant dense<0.000000e+00> : vector<8x128xf32>
    %170 = tpu.matmul %144, %15, %cst_40 {dimension_numbers = #tpu.dot_dimension_numbers<[1], [0], [0], [1], [0, 0, 1, 1], [], []>} : vector<8x32xf32>, vector<32x128xf32>, vector<8x128xf32> -> vector<8x128xf32>
    %171 = arith.addf %169, %170 : vector<8x128xf32>
    %172 = arith.addf %171, %171 : vector<8x128xf32>
    %173 = arith.select %26, %172, %171 : vector<8x128xi1>, vector<8x128xf32>
    %174 = arith.negf %173 : vector<8x128xf32>
    %175 = math.exp %174 : vector<8x128xf32>
    %cst_41 = arith.constant 1.000000e+00 : f32
    %176 = vector.broadcast %cst_41 : f32 to vector<8x128xf32>
    %177 = arith.addf %176, %175 : vector<8x128xf32>
    %178 = arith.divf %176, %177 : vector<8x128xf32>
    %179 = arith.addf %178, %178 : vector<8x128xf32>
    %cst_42 = arith.constant 1.000000e+00 : f32
    %180 = vector.broadcast %cst_42 : f32 to vector<8x128xf32>
    %181 = arith.subf %179, %180 : vector<8x128xf32>
    %182 = arith.select %26, %181, %178 : vector<8x128xi1>, vector<8x128xf32>
    %183 = vector.extract_strided_slice %182 {offsets = [0, 0], sizes = [8, 32], strides = [1, 1]} : vector<8x128xf32> to vector<8x32xf32>
    %184 = vector.extract_strided_slice %182 {offsets = [0, 32], sizes = [8, 32], strides = [1, 1]} : vector<8x128xf32> to vector<8x32xf32>
    %185 = vector.extract_strided_slice %182 {offsets = [0, 64], sizes = [8, 32], strides = [1, 1]} : vector<8x128xf32> to vector<8x32xf32>
    %186 = vector.extract_strided_slice %182 {offsets = [0, 96], sizes = [8, 32], strides = [1, 1]} : vector<8x128xf32> to vector<8x32xf32>
    %187 = arith.mulf %184, %142 : vector<8x32xf32>
    %188 = arith.mulf %183, %185 : vector<8x32xf32>
    %189 = arith.addf %187, %188 : vector<8x32xf32>
    %190 = math.tanh %189 : vector<8x32xf32>
    %191 = arith.mulf %186, %190 : vector<8x32xf32>
    %cst_43 = arith.constant dense<0.000000e+00> : vector<8x128xf32>
    %192 = tpu.matmul %191, %16, %cst_43 {dimension_numbers = #tpu.dot_dimension_numbers<[1], [0], [0], [1], [0, 0, 1, 1], [], []>} : vector<8x32xf32>, vector<32x128xf32>, vector<8x128xf32> -> vector<8x128xf32>
    %cst_44 = arith.constant dense<0.000000e+00> : vector<8x128xf32>
    %193 = tpu.matmul %168, %17, %cst_44 {dimension_numbers = #tpu.dot_dimension_numbers<[1], [0], [0], [1], [0, 0, 1, 1], [], []>} : vector<8x32xf32>, vector<32x128xf32>, vector<8x128xf32> -> vector<8x128xf32>
    %194 = arith.addf %192, %193 : vector<8x128xf32>
    %195 = arith.addf %194, %20 : vector<8x128xf32>
    %196 = arith.addf %195, %195 : vector<8x128xf32>
    %197 = arith.select %26, %196, %195 : vector<8x128xi1>, vector<8x128xf32>
    %198 = arith.negf %197 : vector<8x128xf32>
    %199 = math.exp %198 : vector<8x128xf32>
    %cst_45 = arith.constant 1.000000e+00 : f32
    %200 = vector.broadcast %cst_45 : f32 to vector<8x128xf32>
    %201 = arith.addf %200, %199 : vector<8x128xf32>
    %202 = arith.divf %200, %201 : vector<8x128xf32>
    %203 = arith.addf %202, %202 : vector<8x128xf32>
    %cst_46 = arith.constant 1.000000e+00 : f32
    %204 = vector.broadcast %cst_46 : f32 to vector<8x128xf32>
    %205 = arith.subf %203, %204 : vector<8x128xf32>
    %206 = arith.select %26, %205, %202 : vector<8x128xi1>, vector<8x128xf32>
    %207 = vector.extract_strided_slice %206 {offsets = [0, 0], sizes = [8, 32], strides = [1, 1]} : vector<8x128xf32> to vector<8x32xf32>
    %208 = vector.extract_strided_slice %206 {offsets = [0, 32], sizes = [8, 32], strides = [1, 1]} : vector<8x128xf32> to vector<8x32xf32>
    %209 = vector.extract_strided_slice %206 {offsets = [0, 64], sizes = [8, 32], strides = [1, 1]} : vector<8x128xf32> to vector<8x32xf32>
    %210 = vector.extract_strided_slice %206 {offsets = [0, 96], sizes = [8, 32], strides = [1, 1]} : vector<8x128xf32> to vector<8x32xf32>
    %211 = arith.mulf %208, %166 : vector<8x32xf32>
    %212 = arith.mulf %207, %209 : vector<8x32xf32>
    %213 = arith.addf %211, %212 : vector<8x32xf32>
    %214 = math.tanh %213 : vector<8x32xf32>
    %215 = arith.mulf %210, %214 : vector<8x32xf32>
    %216 = vector.extract_strided_slice %14 {offsets = [32, 0], sizes = [8, 128], strides = [1, 1]} : vector<64x128xf32> to vector<8x128xf32>
    %cst_47 = arith.constant dense<0.000000e+00> : vector<8x128xf32>
    %217 = tpu.matmul %191, %15, %cst_47 {dimension_numbers = #tpu.dot_dimension_numbers<[1], [0], [0], [1], [0, 0, 1, 1], [], []>} : vector<8x32xf32>, vector<32x128xf32>, vector<8x128xf32> -> vector<8x128xf32>
    %218 = arith.addf %216, %217 : vector<8x128xf32>
    %219 = arith.addf %218, %218 : vector<8x128xf32>
    %220 = arith.select %26, %219, %218 : vector<8x128xi1>, vector<8x128xf32>
    %221 = arith.negf %220 : vector<8x128xf32>
    %222 = math.exp %221 : vector<8x128xf32>
    %cst_48 = arith.constant 1.000000e+00 : f32
    %223 = vector.broadcast %cst_48 : f32 to vector<8x128xf32>
    %224 = arith.addf %223, %222 : vector<8x128xf32>
    %225 = arith.divf %223, %224 : vector<8x128xf32>
    %226 = arith.addf %225, %225 : vector<8x128xf32>
    %cst_49 = arith.constant 1.000000e+00 : f32
    %227 = vector.broadcast %cst_49 : f32 to vector<8x128xf32>
    %228 = arith.subf %226, %227 : vector<8x128xf32>
    %229 = arith.select %26, %228, %225 : vector<8x128xi1>, vector<8x128xf32>
    %230 = vector.extract_strided_slice %229 {offsets = [0, 0], sizes = [8, 32], strides = [1, 1]} : vector<8x128xf32> to vector<8x32xf32>
    %231 = vector.extract_strided_slice %229 {offsets = [0, 32], sizes = [8, 32], strides = [1, 1]} : vector<8x128xf32> to vector<8x32xf32>
    %232 = vector.extract_strided_slice %229 {offsets = [0, 64], sizes = [8, 32], strides = [1, 1]} : vector<8x128xf32> to vector<8x32xf32>
    %233 = vector.extract_strided_slice %229 {offsets = [0, 96], sizes = [8, 32], strides = [1, 1]} : vector<8x128xf32> to vector<8x32xf32>
    %234 = arith.mulf %231, %189 : vector<8x32xf32>
    %235 = arith.mulf %230, %232 : vector<8x32xf32>
    %236 = arith.addf %234, %235 : vector<8x32xf32>
    %237 = math.tanh %236 : vector<8x32xf32>
    %238 = arith.mulf %233, %237 : vector<8x32xf32>
    %cst_50 = arith.constant dense<0.000000e+00> : vector<8x128xf32>
    %239 = tpu.matmul %238, %16, %cst_50 {dimension_numbers = #tpu.dot_dimension_numbers<[1], [0], [0], [1], [0, 0, 1, 1], [], []>} : vector<8x32xf32>, vector<32x128xf32>, vector<8x128xf32> -> vector<8x128xf32>
    %cst_51 = arith.constant dense<0.000000e+00> : vector<8x128xf32>
    %240 = tpu.matmul %215, %17, %cst_51 {dimension_numbers = #tpu.dot_dimension_numbers<[1], [0], [0], [1], [0, 0, 1, 1], [], []>} : vector<8x32xf32>, vector<32x128xf32>, vector<8x128xf32> -> vector<8x128xf32>
    %241 = arith.addf %239, %240 : vector<8x128xf32>
    %242 = arith.addf %241, %20 : vector<8x128xf32>
    %243 = arith.addf %242, %242 : vector<8x128xf32>
    %244 = arith.select %26, %243, %242 : vector<8x128xi1>, vector<8x128xf32>
    %245 = arith.negf %244 : vector<8x128xf32>
    %246 = math.exp %245 : vector<8x128xf32>
    %cst_52 = arith.constant 1.000000e+00 : f32
    %247 = vector.broadcast %cst_52 : f32 to vector<8x128xf32>
    %248 = arith.addf %247, %246 : vector<8x128xf32>
    %249 = arith.divf %247, %248 : vector<8x128xf32>
    %250 = arith.addf %249, %249 : vector<8x128xf32>
    %cst_53 = arith.constant 1.000000e+00 : f32
    %251 = vector.broadcast %cst_53 : f32 to vector<8x128xf32>
    %252 = arith.subf %250, %251 : vector<8x128xf32>
    %253 = arith.select %26, %252, %249 : vector<8x128xi1>, vector<8x128xf32>
    %254 = vector.extract_strided_slice %253 {offsets = [0, 0], sizes = [8, 32], strides = [1, 1]} : vector<8x128xf32> to vector<8x32xf32>
    %255 = vector.extract_strided_slice %253 {offsets = [0, 32], sizes = [8, 32], strides = [1, 1]} : vector<8x128xf32> to vector<8x32xf32>
    %256 = vector.extract_strided_slice %253 {offsets = [0, 64], sizes = [8, 32], strides = [1, 1]} : vector<8x128xf32> to vector<8x32xf32>
    %257 = vector.extract_strided_slice %253 {offsets = [0, 96], sizes = [8, 32], strides = [1, 1]} : vector<8x128xf32> to vector<8x32xf32>
    %258 = arith.mulf %255, %213 : vector<8x32xf32>
    %259 = arith.mulf %254, %256 : vector<8x32xf32>
    %260 = arith.addf %258, %259 : vector<8x32xf32>
    %261 = math.tanh %260 : vector<8x32xf32>
    %262 = arith.mulf %257, %261 : vector<8x32xf32>
    %263 = vector.extract_strided_slice %14 {offsets = [40, 0], sizes = [8, 128], strides = [1, 1]} : vector<64x128xf32> to vector<8x128xf32>
    %cst_54 = arith.constant dense<0.000000e+00> : vector<8x128xf32>
    %264 = tpu.matmul %238, %15, %cst_54 {dimension_numbers = #tpu.dot_dimension_numbers<[1], [0], [0], [1], [0, 0, 1, 1], [], []>} : vector<8x32xf32>, vector<32x128xf32>, vector<8x128xf32> -> vector<8x128xf32>
    %265 = arith.addf %263, %264 : vector<8x128xf32>
    %266 = arith.addf %265, %265 : vector<8x128xf32>
    %267 = arith.select %26, %266, %265 : vector<8x128xi1>, vector<8x128xf32>
    %268 = arith.negf %267 : vector<8x128xf32>
    %269 = math.exp %268 : vector<8x128xf32>
    %cst_55 = arith.constant 1.000000e+00 : f32
    %270 = vector.broadcast %cst_55 : f32 to vector<8x128xf32>
    %271 = arith.addf %270, %269 : vector<8x128xf32>
    %272 = arith.divf %270, %271 : vector<8x128xf32>
    %273 = arith.addf %272, %272 : vector<8x128xf32>
    %cst_56 = arith.constant 1.000000e+00 : f32
    %274 = vector.broadcast %cst_56 : f32 to vector<8x128xf32>
    %275 = arith.subf %273, %274 : vector<8x128xf32>
    %276 = arith.select %26, %275, %272 : vector<8x128xi1>, vector<8x128xf32>
    %277 = vector.extract_strided_slice %276 {offsets = [0, 0], sizes = [8, 32], strides = [1, 1]} : vector<8x128xf32> to vector<8x32xf32>
    %278 = vector.extract_strided_slice %276 {offsets = [0, 32], sizes = [8, 32], strides = [1, 1]} : vector<8x128xf32> to vector<8x32xf32>
    %279 = vector.extract_strided_slice %276 {offsets = [0, 64], sizes = [8, 32], strides = [1, 1]} : vector<8x128xf32> to vector<8x32xf32>
    %280 = vector.extract_strided_slice %276 {offsets = [0, 96], sizes = [8, 32], strides = [1, 1]} : vector<8x128xf32> to vector<8x32xf32>
    %281 = arith.mulf %278, %236 : vector<8x32xf32>
    %282 = arith.mulf %277, %279 : vector<8x32xf32>
    %283 = arith.addf %281, %282 : vector<8x32xf32>
    %284 = math.tanh %283 : vector<8x32xf32>
    %285 = arith.mulf %280, %284 : vector<8x32xf32>
    %cst_57 = arith.constant dense<0.000000e+00> : vector<8x128xf32>
    %286 = tpu.matmul %285, %16, %cst_57 {dimension_numbers = #tpu.dot_dimension_numbers<[1], [0], [0], [1], [0, 0, 1, 1], [], []>} : vector<8x32xf32>, vector<32x128xf32>, vector<8x128xf32> -> vector<8x128xf32>
    %cst_58 = arith.constant dense<0.000000e+00> : vector<8x128xf32>
    %287 = tpu.matmul %262, %17, %cst_58 {dimension_numbers = #tpu.dot_dimension_numbers<[1], [0], [0], [1], [0, 0, 1, 1], [], []>} : vector<8x32xf32>, vector<32x128xf32>, vector<8x128xf32> -> vector<8x128xf32>
    %288 = arith.addf %286, %287 : vector<8x128xf32>
    %289 = arith.addf %288, %20 : vector<8x128xf32>
    %290 = arith.addf %289, %289 : vector<8x128xf32>
    %291 = arith.select %26, %290, %289 : vector<8x128xi1>, vector<8x128xf32>
    %292 = arith.negf %291 : vector<8x128xf32>
    %293 = math.exp %292 : vector<8x128xf32>
    %cst_59 = arith.constant 1.000000e+00 : f32
    %294 = vector.broadcast %cst_59 : f32 to vector<8x128xf32>
    %295 = arith.addf %294, %293 : vector<8x128xf32>
    %296 = arith.divf %294, %295 : vector<8x128xf32>
    %297 = arith.addf %296, %296 : vector<8x128xf32>
    %cst_60 = arith.constant 1.000000e+00 : f32
    %298 = vector.broadcast %cst_60 : f32 to vector<8x128xf32>
    %299 = arith.subf %297, %298 : vector<8x128xf32>
    %300 = arith.select %26, %299, %296 : vector<8x128xi1>, vector<8x128xf32>
    %301 = vector.extract_strided_slice %300 {offsets = [0, 0], sizes = [8, 32], strides = [1, 1]} : vector<8x128xf32> to vector<8x32xf32>
    %302 = vector.extract_strided_slice %300 {offsets = [0, 32], sizes = [8, 32], strides = [1, 1]} : vector<8x128xf32> to vector<8x32xf32>
    %303 = vector.extract_strided_slice %300 {offsets = [0, 64], sizes = [8, 32], strides = [1, 1]} : vector<8x128xf32> to vector<8x32xf32>
    %304 = vector.extract_strided_slice %300 {offsets = [0, 96], sizes = [8, 32], strides = [1, 1]} : vector<8x128xf32> to vector<8x32xf32>
    %305 = arith.mulf %302, %260 : vector<8x32xf32>
    %306 = arith.mulf %301, %303 : vector<8x32xf32>
    %307 = arith.addf %305, %306 : vector<8x32xf32>
    %308 = math.tanh %307 : vector<8x32xf32>
    %309 = arith.mulf %304, %308 : vector<8x32xf32>
    %310 = vector.extract_strided_slice %14 {offsets = [48, 0], sizes = [8, 128], strides = [1, 1]} : vector<64x128xf32> to vector<8x128xf32>
    %cst_61 = arith.constant dense<0.000000e+00> : vector<8x128xf32>
    %311 = tpu.matmul %285, %15, %cst_61 {dimension_numbers = #tpu.dot_dimension_numbers<[1], [0], [0], [1], [0, 0, 1, 1], [], []>} : vector<8x32xf32>, vector<32x128xf32>, vector<8x128xf32> -> vector<8x128xf32>
    %312 = arith.addf %310, %311 : vector<8x128xf32>
    %313 = arith.addf %312, %312 : vector<8x128xf32>
    %314 = arith.select %26, %313, %312 : vector<8x128xi1>, vector<8x128xf32>
    %315 = arith.negf %314 : vector<8x128xf32>
    %316 = math.exp %315 : vector<8x128xf32>
    %cst_62 = arith.constant 1.000000e+00 : f32
    %317 = vector.broadcast %cst_62 : f32 to vector<8x128xf32>
    %318 = arith.addf %317, %316 : vector<8x128xf32>
    %319 = arith.divf %317, %318 : vector<8x128xf32>
    %320 = arith.addf %319, %319 : vector<8x128xf32>
    %cst_63 = arith.constant 1.000000e+00 : f32
    %321 = vector.broadcast %cst_63 : f32 to vector<8x128xf32>
    %322 = arith.subf %320, %321 : vector<8x128xf32>
    %323 = arith.select %26, %322, %319 : vector<8x128xi1>, vector<8x128xf32>
    %324 = vector.extract_strided_slice %323 {offsets = [0, 0], sizes = [8, 32], strides = [1, 1]} : vector<8x128xf32> to vector<8x32xf32>
    %325 = vector.extract_strided_slice %323 {offsets = [0, 32], sizes = [8, 32], strides = [1, 1]} : vector<8x128xf32> to vector<8x32xf32>
    %326 = vector.extract_strided_slice %323 {offsets = [0, 64], sizes = [8, 32], strides = [1, 1]} : vector<8x128xf32> to vector<8x32xf32>
    %327 = vector.extract_strided_slice %323 {offsets = [0, 96], sizes = [8, 32], strides = [1, 1]} : vector<8x128xf32> to vector<8x32xf32>
    %328 = arith.mulf %325, %283 : vector<8x32xf32>
    %329 = arith.mulf %324, %326 : vector<8x32xf32>
    %330 = arith.addf %328, %329 : vector<8x32xf32>
    %331 = math.tanh %330 : vector<8x32xf32>
    %332 = arith.mulf %327, %331 : vector<8x32xf32>
    %cst_64 = arith.constant dense<0.000000e+00> : vector<8x128xf32>
    %333 = tpu.matmul %332, %16, %cst_64 {dimension_numbers = #tpu.dot_dimension_numbers<[1], [0], [0], [1], [0, 0, 1, 1], [], []>} : vector<8x32xf32>, vector<32x128xf32>, vector<8x128xf32> -> vector<8x128xf32>
    %cst_65 = arith.constant dense<0.000000e+00> : vector<8x128xf32>
    %334 = tpu.matmul %309, %17, %cst_65 {dimension_numbers = #tpu.dot_dimension_numbers<[1], [0], [0], [1], [0, 0, 1, 1], [], []>} : vector<8x32xf32>, vector<32x128xf32>, vector<8x128xf32> -> vector<8x128xf32>
    %335 = arith.addf %333, %334 : vector<8x128xf32>
    %336 = arith.addf %335, %20 : vector<8x128xf32>
    %337 = arith.addf %336, %336 : vector<8x128xf32>
    %338 = arith.select %26, %337, %336 : vector<8x128xi1>, vector<8x128xf32>
    %339 = arith.negf %338 : vector<8x128xf32>
    %340 = math.exp %339 : vector<8x128xf32>
    %cst_66 = arith.constant 1.000000e+00 : f32
    %341 = vector.broadcast %cst_66 : f32 to vector<8x128xf32>
    %342 = arith.addf %341, %340 : vector<8x128xf32>
    %343 = arith.divf %341, %342 : vector<8x128xf32>
    %344 = arith.addf %343, %343 : vector<8x128xf32>
    %cst_67 = arith.constant 1.000000e+00 : f32
    %345 = vector.broadcast %cst_67 : f32 to vector<8x128xf32>
    %346 = arith.subf %344, %345 : vector<8x128xf32>
    %347 = arith.select %26, %346, %343 : vector<8x128xi1>, vector<8x128xf32>
    %348 = vector.extract_strided_slice %347 {offsets = [0, 0], sizes = [8, 32], strides = [1, 1]} : vector<8x128xf32> to vector<8x32xf32>
    %349 = vector.extract_strided_slice %347 {offsets = [0, 32], sizes = [8, 32], strides = [1, 1]} : vector<8x128xf32> to vector<8x32xf32>
    %350 = vector.extract_strided_slice %347 {offsets = [0, 64], sizes = [8, 32], strides = [1, 1]} : vector<8x128xf32> to vector<8x32xf32>
    %351 = vector.extract_strided_slice %347 {offsets = [0, 96], sizes = [8, 32], strides = [1, 1]} : vector<8x128xf32> to vector<8x32xf32>
    %352 = arith.mulf %349, %307 : vector<8x32xf32>
    %353 = arith.mulf %348, %350 : vector<8x32xf32>
    %354 = arith.addf %352, %353 : vector<8x32xf32>
    %355 = math.tanh %354 : vector<8x32xf32>
    %356 = arith.mulf %351, %355 : vector<8x32xf32>
    %357 = vector.extract_strided_slice %14 {offsets = [56, 0], sizes = [8, 128], strides = [1, 1]} : vector<64x128xf32> to vector<8x128xf32>
    %cst_68 = arith.constant dense<0.000000e+00> : vector<8x128xf32>
    %358 = tpu.matmul %332, %15, %cst_68 {dimension_numbers = #tpu.dot_dimension_numbers<[1], [0], [0], [1], [0, 0, 1, 1], [], []>} : vector<8x32xf32>, vector<32x128xf32>, vector<8x128xf32> -> vector<8x128xf32>
    %359 = arith.addf %357, %358 : vector<8x128xf32>
    %360 = arith.addf %359, %359 : vector<8x128xf32>
    %361 = arith.select %26, %360, %359 : vector<8x128xi1>, vector<8x128xf32>
    %362 = arith.negf %361 : vector<8x128xf32>
    %363 = math.exp %362 : vector<8x128xf32>
    %cst_69 = arith.constant 1.000000e+00 : f32
    %364 = vector.broadcast %cst_69 : f32 to vector<8x128xf32>
    %365 = arith.addf %364, %363 : vector<8x128xf32>
    %366 = arith.divf %364, %365 : vector<8x128xf32>
    %367 = arith.addf %366, %366 : vector<8x128xf32>
    %cst_70 = arith.constant 1.000000e+00 : f32
    %368 = vector.broadcast %cst_70 : f32 to vector<8x128xf32>
    %369 = arith.subf %367, %368 : vector<8x128xf32>
    %370 = arith.select %26, %369, %366 : vector<8x128xi1>, vector<8x128xf32>
    %371 = vector.extract_strided_slice %370 {offsets = [0, 0], sizes = [8, 32], strides = [1, 1]} : vector<8x128xf32> to vector<8x32xf32>
    %372 = vector.extract_strided_slice %370 {offsets = [0, 32], sizes = [8, 32], strides = [1, 1]} : vector<8x128xf32> to vector<8x32xf32>
    %373 = vector.extract_strided_slice %370 {offsets = [0, 64], sizes = [8, 32], strides = [1, 1]} : vector<8x128xf32> to vector<8x32xf32>
    %374 = vector.extract_strided_slice %370 {offsets = [0, 96], sizes = [8, 32], strides = [1, 1]} : vector<8x128xf32> to vector<8x32xf32>
    %375 = arith.mulf %372, %330 : vector<8x32xf32>
    %376 = arith.mulf %371, %373 : vector<8x32xf32>
    %377 = arith.addf %375, %376 : vector<8x32xf32>
    %378 = math.tanh %377 : vector<8x32xf32>
    %379 = arith.mulf %374, %378 : vector<8x32xf32>
    %cst_71 = arith.constant dense<0.000000e+00> : vector<8x128xf32>
    %380 = tpu.matmul %379, %16, %cst_71 {dimension_numbers = #tpu.dot_dimension_numbers<[1], [0], [0], [1], [0, 0, 1, 1], [], []>} : vector<8x32xf32>, vector<32x128xf32>, vector<8x128xf32> -> vector<8x128xf32>
    %cst_72 = arith.constant dense<0.000000e+00> : vector<8x128xf32>
    %381 = tpu.matmul %356, %17, %cst_72 {dimension_numbers = #tpu.dot_dimension_numbers<[1], [0], [0], [1], [0, 0, 1, 1], [], []>} : vector<8x32xf32>, vector<32x128xf32>, vector<8x128xf32> -> vector<8x128xf32>
    %382 = arith.addf %380, %381 : vector<8x128xf32>
    %383 = arith.addf %382, %20 : vector<8x128xf32>
    %384 = arith.addf %383, %383 : vector<8x128xf32>
    %385 = arith.select %26, %384, %383 : vector<8x128xi1>, vector<8x128xf32>
    %386 = arith.negf %385 : vector<8x128xf32>
    %387 = math.exp %386 : vector<8x128xf32>
    %cst_73 = arith.constant 1.000000e+00 : f32
    %388 = vector.broadcast %cst_73 : f32 to vector<8x128xf32>
    %389 = arith.addf %388, %387 : vector<8x128xf32>
    %390 = arith.divf %388, %389 : vector<8x128xf32>
    %391 = arith.addf %390, %390 : vector<8x128xf32>
    %cst_74 = arith.constant 1.000000e+00 : f32
    %392 = vector.broadcast %cst_74 : f32 to vector<8x128xf32>
    %393 = arith.subf %391, %392 : vector<8x128xf32>
    %394 = arith.select %26, %393, %390 : vector<8x128xi1>, vector<8x128xf32>
    %395 = vector.extract_strided_slice %394 {offsets = [0, 0], sizes = [8, 32], strides = [1, 1]} : vector<8x128xf32> to vector<8x32xf32>
    %396 = vector.extract_strided_slice %394 {offsets = [0, 32], sizes = [8, 32], strides = [1, 1]} : vector<8x128xf32> to vector<8x32xf32>
    %397 = vector.extract_strided_slice %394 {offsets = [0, 64], sizes = [8, 32], strides = [1, 1]} : vector<8x128xf32> to vector<8x32xf32>
    %398 = vector.extract_strided_slice %394 {offsets = [0, 96], sizes = [8, 32], strides = [1, 1]} : vector<8x128xf32> to vector<8x32xf32>
    %399 = arith.mulf %396, %354 : vector<8x32xf32>
    %400 = arith.mulf %395, %397 : vector<8x32xf32>
    %401 = arith.addf %399, %400 : vector<8x32xf32>
    %402 = math.tanh %401 : vector<8x32xf32>
    %403 = arith.mulf %398, %402 : vector<8x32xf32>
    %c0_75 = arith.constant 0 : index
    %c0_76 = arith.constant 0 : index
    %404 = vector.load %arg9[%c0_75, %c0_76] : memref<1x32xf32, #tpu.memory_space<vmem>>, vector<1x32xf32>
    %405 = vector.broadcast %404 : vector<1x32xf32> to vector<8x32xf32>
    %406 = arith.mulf %379, %405 : vector<8x32xf32>
    %c0_77 = arith.constant 0 : index
    %c0_78 = arith.constant 0 : index
    %407 = vector.load %arg10[%c0_77, %c0_78] : memref<1x32xf32, #tpu.memory_space<vmem>>, vector<1x32xf32>
    %408 = vector.broadcast %407 : vector<1x32xf32> to vector<8x32xf32>
    %409 = arith.mulf %403, %408 : vector<8x32xf32>
    %410 = arith.addf %406, %409 : vector<8x32xf32>
    %cst_79 = arith.constant dense<0.000000e+00> : vector<8xf32>
    %411 = vector.multi_reduction <add>, %410, %cst_79 [1] : vector<8x32xf32> to vector<8xf32>
    %412 = vector.shape_cast %411 : vector<8xf32> to vector<8x1xf32>
    %c0_80 = arith.constant 0 : index
    %c0_81 = arith.constant 0 : index
    %413 = vector.load %arg11[%c0_80, %c0_81] : memref<1x1xf32, #tpu.memory_space<vmem>>, vector<1x1xf32>
    %414 = vector.broadcast %413 : vector<1x1xf32> to vector<8x1xf32>
    %415 = arith.addf %412, %414 : vector<8x1xf32>
    %c0_82 = arith.constant 0 : index
    %c0_83 = arith.constant 0 : index
    %416 = vector.load %arg12[%c0_82, %c0_83] : memref<8x1xf32, #tpu.memory_space<vmem>>, vector<8x1xf32>
    tpu.vector_store %arg12[%c0_82, %c0_83], %415 {strides = array<i32>} : memref<8x1xf32, #tpu.memory_space<vmem>>, vector<8x1xf32>,
    return
  }
}

</mosaic_0001>

<bundles_post_ra>
// kernel: tpu_custom_call.1
= control target key start
LH: loop header
LB: loop body
LE: loop exit
PB: predicated region body
PF: predicated region fallthrough
CT: control target
= control target key end

     0   :  { %s3982_s0 = inlined_call_operand.vmem [shape: f32[64,1], index: 0, kind: input, shape index: {}]   ;;  %s3983_s1 = inlined_call_operand.vmem [shape: f32[1,32], index: 1, kind: input, shape index: {}]   ;;  %s3984_s2 = inlined_call_operand.vmem [shape: f32[1,32], index: 2, kind: input, shape index: {}]   ;;  %s3985_s3 = inlined_call_operand.vmem [shape: f32[32,128], index: 3, kind: input, shape index: {}]   ;;  %s3986_s4 = inlined_call_operand.vmem [shape: f32[32,128], index: 4, kind: input, shape index: {}]   ;;  %s3987_s5 = inlined_call_operand.vmem [shape: f32[1,128], index: 5, kind: input, shape index: {}]   ;;  %s3988_s6 = inlined_call_operand.hbm [shape: f32[32,128], index: 6, kind: input, shape index: {}]   ;;  %s3989_s7 = inlined_call_operand.hbm [shape: f32[32,128], index: 7, kind: input, shape index: {}]   ;;  %s3990_s8 = inlined_call_operand.vmem [shape: f32[1,128], index: 8, kind: input, shape index: {}]   ;;  %s3991_s9 = inlined_call_operand.vmem [shape: f32[1,32], index: 9, kind: input, shape index: {}]   ;;  %s3992_s10 = inlined_call_operand.vmem [shape: f32[1,32], index: 10, kind: input, shape index: {}]   ;;  %s3993_s11 = inlined_call_operand.<no memory space> [shape: f32[1,1], index: 11, kind: input, shape index: {}]   ;;  %s3994_s12 = inlined_call_operand.vmem [shape: f32[8,1], index: 12, kind: output, shape index: {}]  }
   0x1   :  { %v17_v0 = vstv %s3993_s11 }
   0x2   :  { %18 = vst [vmem:[#allocation2] sm:$0x1] %v17_v0 }
   0x3   :  { %19 = vsyncpa [#allocation4], 0 }
   0x4   :  { %20 = vsyncpa [#allocation6], 0  ;;  %s3239_s23 = smov [#allocation3]  }
   0x5   :  { %s38_s24 = sshll.u32 %s3239_s23, 4  ;;  %s39_s24 = int_to_ptr.vmem [resolvable:$true] %s38_s24 }
   0x6   :  { %s3203_s25 = scalar_lea.vmem %s39_s24, 512  ;;  %p3208_p1 = scmp.lt.s32.totalorder %s39_s24, %s39_s24 }
   0x7   :  { %p3204_p0 = scmp.ne.s32.totalorder %s39_s24, %s3203_s25  ;;  %p3209_p2 = scmp.lt.s32.totalorder %s3203_s25, %s3203_s25 }
   0x9   :  { %p3210_p3 = por %p3209_p2, %p3208_p1 }
   0xb   :  { %p3211_p4 = pnand %p3210_p3, %p3204_p0 }
   0xd   :  { %3214 = shalt.err (!%p3211_p4)
}
   0xe   :  { %s3240_s26 = smov 128   ;;  %s3241_s27 = smov 8  }
   0xf   :  { %44 = dma.hbm_to_vmem [thread:$0]  %s3988_s6, 512, %s39_s24, [#allocation4], %s3240_s26, %s3240_s26, %s3241_s27  }
  0x10   :  { %s3242_s11 = smov [#allocation5]  }
  0x11   :  { %s50_s30 = sshll.u32 %s3242_s11, 4  ;;  %s51_s30 = int_to_ptr.vmem [resolvable:$true] %s50_s30 }
  0x12   :  { %s3223_s13 = scalar_lea.vmem %s51_s30, 512  ;;  %p3228_p6 = scmp.lt.s32.totalorder %s51_s30, %s51_s30 }
  0x13   :  { %p3224_p5 = scmp.ne.s32.totalorder %s51_s30, %s3223_s13  ;;  %p3229_p7 = scmp.lt.s32.totalorder %s3223_s13, %s3223_s13 }
  0x15   :  { %p3230_p8 = por %p3229_p7, %p3228_p6 }
  0x17   :  { %p3231_p9 = pnand %p3230_p8, %p3224_p5 }
  0x19   :  { %3234 = shalt.err (!%p3231_p9)
}
  0x1a   :  { %56 = dma.hbm_to_vmem [thread:$0]  %s3989_s7, 512, %s51_s30, [#allocation6], %s3240_s26, %s3240_s26, %s3241_s27  }
  0x1b   :  { %3235 = dma.done.wait [#allocation4], 512  }
  0x1c   :  { %3236 = vsyncadd [#allocation4], 4294966784 }
  0x1d   :  { %3237 = dma.done.wait [#allocation6], 512  }
  0x1e   :  { %3238 = vsyncadd [#allocation6], 4294966784  ;;  %v3243_v1 = vmov 0   ;;  %v71_v2 = vld [vmem:[%s3982_s0] sm:$0xff]  ;;  %v160_v3 = vld [vmem:[%s3985_s3 + $0x18] sm:$0xff]  ;;  %v3244_v5 = vmov 0.0   ;;  %v317_v25 = vlaneseq }
  0x1f   :  { %3083 = vset.pattern.permute.xlu0 %v3243_v1  ;;  %3084 = vset.pattern.permute.xlu1 %v3243_v1  ;;  %v159_v4 = vld [vmem:[%s3985_s3 + $0x10] sm:$0xff]  ;;  %v72_v6 = vld [vmem:[%s3982_s0 + $0x8] sm:$0xff]  ;;  %v3339_v7 = vld [vmem:[%s3986_s4 + $0x18] sm:$0xff]  ;;  %vm3245_vm0 = vmmov 0   ;;  %vm168_vm1 = vcmask 261120   ;;  %s3246_s17 = smov 64  }
  0x20   :  { %82 = vperm.xlu0 %3083, %v71_v2   ;;  %2809 = vmatprep.subr.mxu1 %v3244_v5  ;;  %v158_v8 = vld [vmem:[%s3985_s3 + $0x8] sm:$0xff]  ;;  %v3348_v9 = vld [vmem:[%s3986_s4 + $0x10] sm:$0xff]  ;;  %v157_v10 = vld [vmem:[%s3985_s3] sm:$0xff]  ;;  %v318_v26 = vand.u32 127, %v317_v25  ;;  %s3247_s18 = smov 32   ;;  %s3248_s7 = smov 96  }
  0x21   :  { %2789 = vmatprep.subr.mxu0 %v160_v3  ;;  %2810 = vmatpush3.msra.mxu1 %v3339_v7  ;;  %v3357_v11 = vld [vmem:[%s3986_s4 + $0x8] sm:$0xff]  ;;  %v3364_v12 = vld [vmem:[%s3986_s4] sm:$0xff]  ;;  %v73_v44 = vld [vmem:[%s3982_s0 + $0x10] sm:$0xff]  ;;  %vm2580_vm5 = vcmask 7168  }
  0x22   :  { %2790 = vmatpush3.msra.mxu0 %v160_v3  ;;  %2811 = vmatprep.subr.mxu1 %v3244_v5  ;;  %v3379_v13 = vld [vmem:[%s3983_s1] ss:$0 sm:$0xff]  ;;  %vm319_vm2 = vcmp.ge.s32.totalorder %v318_v26, 64  ;;  %vm320_vm3 = vcmp.lt.s32.totalorder %v318_v26, 96  ;;  %v77_v46 = vld [vmem:[%s3982_s0 + $0x30] sm:$0xff]  ;;  %v74_v54 = vld [vmem:[%s3982_s0 + $0x18] sm:$0xff] }
  0x23   :  { %2791 = vmatprep.subr.mxu0 %v159_v4  ;;  %2812 = vmatpush3.msra.mxu1 %v3348_v9  ;;  %v3384_v15 = vld [vmem:[%s3984_s2] ss:$0 sm:$0xff]  ;;  %vm3400_vm4 = vmand %vm319_vm2, %vm320_vm3  ;;  %v76_v56 = vld [vmem:[%s3982_s0 + $0x28] sm:$0xff] }
  0x24   :  { %87 = vperm.xlu0 %3083, %v72_v6   ;;  %2792 = vmatpush3.msra.mxu0 %v159_v4  ;;  %v3397_v28 = vld [vmem:[%s3987_s5] ss:$0 sm:$0xff]  ;;  %v78_v57 = vld [vmem:[%s3982_s0 + $0x38] sm:$0xff]  ;;  %v3452_v62 = vld [vmem:[#allocation5 + $0x8] sm:$0xff] }
  0x25   :  { %2793 = vmatprep.subr.mxu0 %v158_v8  ;;  %2813 = vmatprep.subr.mxu1 %v3244_v5  ;;  %v75_v45 = vld [vmem:[%s3982_s0 + $0x20] sm:$0xff]  ;;  %v3444_v60 = vld [vmem:[#allocation5 + $0x10] sm:$0xff]  ;;  %v3454_v63 = vld [vmem:[#allocation3 + $0x8] sm:$0xff] }
  0x26   :  { %2794 = vmatpush3.msra.mxu0 %v158_v8  ;;  %2814 = vmatpush3.msra.mxu1 %v3357_v11  ;;  %v3440_v58 = vld [vmem:[#allocation3 + $0x18] sm:$0xff]  ;;  %v3448_v61 = vld [vmem:[#allocation3 + $0x10] sm:$0xff]  ;;  %v3459_v0 = vld [vmem:[#allocation5] sm:$0xff] }
  0x27   :  { %2795 = vmatprep.subr.mxu0 %v157_v10  ;;  %2815 = vmatprep.subr.mxu1 %v3244_v5  ;;  %v3442_v59 = vld [vmem:[#allocation5 + $0x18] sm:$0xff]  ;;  %v3462_v1 = vld [vmem:[#allocation3] sm:$0xff] }
  0x28   :  { %2796 = vmatpush3.msra.mxu0 %v157_v10  ;;  %2816 = vmatpush3.msra.mxu1 %v3364_v12  ;;  %v2655_v32 = vld [vmem:[%s3992_s10] ss:$0 sm:$0xff] }
  0x29   :  { %2817 = vmatprep.mubr.msk.f32.mxu1 %vm3245_vm0, %v3244_v5  ;;  %2831 = vmatprep.subr.mxu0 %v3244_v5 }
  0x2a   :  { %2818 = vmatmul.mubr.f32.vlgmr.msra.gmra.mxu1 %v3244_v5  ;;  %2820 = vmatprep.subr.mxu1 %v3244_v5 }
  0x2b   :  { %2828 = vmatprep.mubr.msk.f32.mxu1 %vm3245_vm0, %v3244_v5  ;;  %2821 = vmatpush3.msra.mxu1 %v3442_v59 }
  0x2c   :  { %2822 = vmatprep.subr.mxu1 %v3244_v5 }
  0x2d   :  { %2823 = vmatpush3.msra.mxu1 %v3444_v60 }
  0x2e   :  { %2824 = vmatprep.subr.mxu1 %v3244_v5 }
  0x2f   :  { %2825 = vmatpush3.msra.mxu1 %v3452_v62 }
  0x30   :  { %2826 = vmatprep.subr.mxu1 %v3244_v5 }
  0x31   :  { %2827 = vmatpush3.msra.mxu1 %v3459_v0 }
  0x32   :  { %2842 = vmatprep.subr.mxu1 %v3244_v5  ;;  %2829 = vmatmul.mubr.f32.vlgmr.msra.gmra.mxu1 %v3244_v5 }
  0x33   :  { %2843 = vmatpush3.msra.mxu1 %v3339_v7  ;;  %2850 = vmatprep.mubr.msk.f32.mxu1 %vm3245_vm0, %v3244_v5 }
  0x34   :  { %2844 = vmatprep.subr.mxu1 %v3244_v5 }
  0x35   :  { %2845 = vmatpush3.msra.mxu1 %v3348_v9 }
  0x36   :  { %2846 = vmatprep.subr.mxu1 %v3244_v5 }
  0x37   :  { %2847 = vmatpush3.msra.mxu1 %v3357_v11 }
  0x38   :  { %2848 = vmatprep.subr.mxu1 %v3244_v5 }
  0x39   :  { %2849 = vmatpush3.msra.mxu1 %v3364_v12 }
  0x3a   :  { %2864 = vmatprep.subr.mxu1 %v3244_v5 }
  0x9b   :  { %v83_v14 = vpop.permute.xlu0 %82 }
  0x9c   :  { %v126_v16 = vmul.f32 %v3379_v13, %v83_v14 }
  0x9e   :  { %v141_v17 = vadd.f32 %v3384_v15, %v126_v16 }
  0x9f   :  { %v88_v18 = vpop.permute.xlu0 %87 }
  0xa0   :  { %v127_v19 = vmul.f32 %v3379_v13, %v88_v18  ;;  %v149_v20 = vmax.f32 %v141_v17, 0.0 }
  0xa2   :  { %v142_v21 = vadd.f32 %v3384_v15, %v127_v19  ;;  %2797 = vmatprep.mubr.msk.f32.mxu0 %vm168_vm1, %v149_v20 }
  0xa4   :  { %v150_v22 = vmax.f32 %v142_v21, 0.0 }
  0xa6   :  { %2798 = vmatmul.mubr.msk.f32.vlgmr.msra.gmra.mxu0 %vm168_vm1, %v150_v22 }
  0xa7   :  { %2832 = vmatpush3.msra.mxu0 %v3440_v58 }
  0xa8   :  { %2833 = vmatprep.subr.mxu0 %v3244_v5 }
  0xa9   :  { %2834 = vmatpush3.msra.mxu0 %v3448_v61 }
  0xaa   :  { %2835 = vmatprep.subr.mxu0 %v3244_v5 }
  0xab   :  { %2836 = vmatpush3.msra.mxu0 %v3454_v63 }
  0xac   :  { %2837 = vmatprep.subr.mxu0 %v3244_v5 }
  0xad   :  { %2838 = vmatpush3.msra.mxu0 %v3462_v1 }
  0xae   :  { %2853 = vmatprep.subr.mxu0 %v3244_v5 }
  0xea   :  { %v391_v23 = vpop.f32.mrf.mxu1 }
  0xec   :  { %v2819_v24 = vpop.f32.mrf.mxu1 }
 0x166   :  { %v3392_v27 = vpop.f32.mrf.mxu0 }
 0x168   :  { %v259_v29 = vpop.f32.mrf.mxu0 }
 0x169   :  { %v260_v30 = vadd.f32 %v3397_v28, %v259_v29 }
 0x16b   :  { %v395_v31 = vadd.f32 %v391_v23, %v260_v30 }
 0x16d   :  { %v396_v33 = vadd.f32 %v395_v31, %v395_v31 }
 0x16f   :  { %v397_v34 = vsel %vm3400_vm4, %v396_v33, %v395_v31 }
 0x170   :  { %v2600_v35 = vmul.f32 -1.442695, %v397_v34  ;;  %v490_v34 = vpop.f32.mrf.mxu1 }
 0x172   :  { %3085 = vpow2.f32 %v2600_v35  ;;  %v2830_v35 = vpop.f32.mrf.mxu1 }
 0x17f   :  { %v3086_v36 = vpop.eup %3085 }
 0x180   :  { %v401_v37 = vadd.f32 1.0, %v3086_v36 }
 0x182   :  { %3087 = vrcp.f32 %v401_v37 }
 0x18f   :  { %v3088_v38 = vpop.eup %3087 }
 0x190   :  { %v404_v39 = vadd.f32 %v3088_v38, %v3088_v38 }
 0x192   :  { %v2601_v40 = vadd.f32 -1.0, %v404_v39 }
 0x194   :  { %v3408_v41 = vsel %vm3400_vm4, %v2601_v40, %v3088_v38 }
 0x195   :  { %409 = vrot.lane.b32.xlu1 %v3408_v41, %s3246_s17  ;;  %v407_v47 = vmul.f32 0.0, %v3408_v41 }
 0x207   :  { %v410_v42 = vpop.permute.xlu1 %409 }
 0x208   :  { %v412_v43 = vmul.f32 %v410_v42, %v3408_v41  ;;  %v3541_v42 = vld [vmem:[%s3990_s8] ss:$0 sm:$0xff] }
 0x20a   :  { %414 = vrot.lane.b32.xlu1 %v412_v43, %s3247_s18 }
 0x20e   :  { %92 = vperm.xlu1 %3084, %v73_v44  }
 0x212   :  { %102 = vperm.xlu1 %3084, %v75_v45  }
 0x216   :  { %112 = vperm.xlu1 %3084, %v77_v46  }
 0x27c   :  { %v415_v48 = vpop.permute.xlu1 %414 }
 0x27d   :  { %v3424_v49 = vadd.f32 %v415_v48, %v407_v47 }
 0x27f   :  { %3089 = vtanh.f32 %v3424_v49 }
 0x289   :  { %v93_v50 = vpop.permute.xlu1 %92 }
 0x28a   :  { %v128_v51 = vmul.f32 %v3379_v13, %v93_v50 }
 0x28c   :  { %v3090_v52 = vpop.eup %3089  ;;  %v143_v53 = vadd.f32 %v3384_v15, %v128_v51 }
 0x28d   :  { %420 = vrot.lane.b32.xlu0 %v3090_v52, %s3246_s17  ;;  %v103_v4 = vpop.permute.xlu1 %102 }
 0x28e   :  { %v151_v55 = vmax.f32 %v143_v53, 0.0  ;;  %v130_v6 = vmul.f32 %v3379_v13, %v103_v4 }
 0x290   :  { %2800 = vmatprep.mubr.msk.f32.mxu0 %vm168_vm1, %v151_v55  ;;  %v145_v14 = vadd.f32 %v3384_v15, %v130_v6 }
 0x291   :  { %97 = vperm.xlu0 %3083, %v74_v54   ;;  %v113_v8 = vpop.permute.xlu1 %112 }
 0x292   :  { %v132_v16 = vmul.f32 %v3379_v13, %v113_v8  ;;  %v153_v19 = vmax.f32 %v145_v14, 0.0 }
 0x294   :  { %v147_v21 = vadd.f32 %v3384_v15, %v132_v16 }
 0x295   :  { %107 = vperm.xlu0 %3083, %v76_v56  }
 0x296   :  { %v155_v25 = vmax.f32 %v147_v21, 0.0 }
 0x299   :  { %117 = vperm.xlu0 %3083, %v78_v57  }
 0x2ff   :  { %v421_v2 = vpop.permute.xlu0 %420 }
 0x300   :  { %v423_v3 = vmul.f32 %v421_v2, %v3408_v41  ;;  %v265_v41 = vadd.f32 %v3392_v27, %v3397_v28 }
 0x302   :  { %495 = vrot.lane.b32.xlu1 %v423_v3, %s3247_s18 }
 0x30c   :  { %v98_v10 = vpop.permute.xlu0 %97 }
 0x30d   :  { %v129_v17 = vmul.f32 %v3379_v13, %v98_v10 }
 0x30f   :  { %v144_v18 = vadd.f32 %v3384_v15, %v129_v17 }
 0x310   :  { %v108_v20 = vpop.permute.xlu0 %107 }
 0x311   :  { %v152_v22 = vmax.f32 %v144_v18, 0.0  ;;  %v131_v23 = vmul.f32 %v3379_v13, %v108_v20 }
 0x313   :  { %v146_v24 = vadd.f32 %v3384_v15, %v131_v23  ;;  %2801 = vmatmul.mubr.msk.f32.gmra.mxu0 %vm168_vm1, %v152_v22 }
 0x314   :  { %v118_v26 = vpop.permute.xlu0 %117  ;;  %2803 = vmatprep.mubr.msk.f32.mxu0 %vm168_vm1, %v153_v19 }
 0x315   :  { %v154_v29 = vmax.f32 %v146_v24, 0.0  ;;  %v133_v30 = vmul.f32 %v3379_v13, %v118_v26 }
 0x317   :  { %v148_v31 = vadd.f32 %v3384_v15, %v133_v30  ;;  %2804 = vmatmul.mubr.msk.f32.gmra.mxu0 %vm168_vm1, %v154_v29 }
 0x318   :  { %2806 = vmatprep.mubr.msk.f32.mxu0 %vm168_vm1, %v155_v25 }
 0x319   :  { %v156_v33 = vmax.f32 %v148_v31, 0.0 }
 0x31b   :  { %2807 = vmatmul.mubr.msk.f32.gmra.mxu0 %vm168_vm1, %v156_v33 }
 0x31c   :  { %2839 = vmatprep.mubr.msk.f32.mxu0 %vm3245_vm0, %v3244_v5 }
 0x374   :  { %v496_v36 = vpop.permute.xlu1 %495 }
 0x375   :  { %2840 = vmatmul.mubr.msk.f32.vlgmr.msra.gmra.mxu0 %vm168_vm1, %v496_v36  ;;  %2851 = vmatmul.mubr.msk.f32.vlgmr.msra.gmra.mxu1 %vm168_vm1, %v496_v36 }
 0x376   :  { %2865 = vmatpush3.msra.mxu1 %v3440_v58  ;;  %2854 = vmatpush3.msra.mxu0 %v3442_v59 }
 0x377   :  { %2866 = vmatprep.subr.mxu1 %v3244_v5  ;;  %2855 = vmatprep.subr.mxu0 %v3244_v5 }
 0x378   :  { %2867 = vmatpush3.msra.mxu1 %v3448_v61  ;;  %2856 = vmatpush3.msra.mxu0 %v3444_v60 }
 0x379   :  { %2868 = vmatprep.subr.mxu1 %v3244_v5  ;;  %2857 = vmatprep.subr.mxu0 %v3244_v5 }
 0x37a   :  { %2869 = vmatpush3.msra.mxu1 %v3454_v63  ;;  %2858 = vmatpush3.msra.mxu0 %v3452_v62 }
 0x37b   :  { %2870 = vmatprep.subr.mxu1 %v3244_v5  ;;  %2872 = vmatprep.mubr.msk.f32.mxu1 %vm3245_vm0, %v3244_v5 }
 0x37c   :  { %2871 = vmatpush3.msra.mxu1 %v3462_v1  ;;  %2859 = vmatprep.subr.mxu0 %v3244_v5 }
 0x37d   :  { %2860 = vmatpush3.msra.mxu0 %v3459_v0  ;;  %2861 = vmatprep.mubr.msk.f32.mxu0 %vm3245_vm0, %v3244_v5 }
 0x37e   :  { %2875 = vmatprep.subr.mxu0 %v3244_v5  ;;  %2886 = vmatprep.subr.mxu1 %v3244_v5 }
 0x3d3   :  { %v3524_v13 = vpop.f32.mrf.mxu0 }
 0x3d5   :  { %v3526_v15 = vpop.f32.mrf.mxu0 }
 0x3d7   :  { %v3528_v37 = vpop.f32.mrf.mxu0 }
 0x3d9   :  { %v3530_v38 = vpop.f32.mrf.mxu0 }
 0x3db   :  { %v3532_v39 = vpop.f32.mrf.mxu0 }
 0x3dd   :  { %v3534_v40 = vpop.f32.mrf.mxu0 }
 0x435   :  { %v565_v43 = vpop.f32.mrf.mxu0  ;;  %v664_v44 = vpop.f32.mrf.mxu1 }
 0x436   :  { %v566_v45 = vadd.f32 %v565_v43, %v490_v34  ;;  %v668_v46 = vadd.f32 %v664_v44, %v265_v41 }
 0x437   :  { %v2841_v47 = vpop.f32.mrf.mxu0  ;;  %v2852_v48 = vpop.f32.mrf.mxu1 }
 0x438   :  { %v569_v50 = vadd.f32 %v3541_v42, %v566_v45  ;;  %v669_v51 = vadd.f32 %v668_v46, %v668_v46 }
 0x43a   :  { %v570_v52 = vadd.f32 %v569_v50, %v569_v50  ;;  %v670_v53 = vsel %vm3400_vm4, %v669_v51, %v668_v46 }
 0x43b   :  { %v2606_v54 = vmul.f32 -1.442695, %v670_v53 }
 0x43c   :  { %v571_v27 = vsel %vm3400_vm4, %v570_v52, %v569_v50  ;;  %v270_v52 = vadd.f32 %v3397_v28, %v3526_v15 }
 0x43d   :  { %v2603_v55 = vmul.f32 -1.442695, %v571_v27  ;;  %3091 = vpow2.f32 %v2606_v54 }
 0x43f   :  { %3093 = vpow2.f32 %v2603_v55 }
 0x44a   :  { %v3092_v56 = vpop.eup %3091 }
 0x44b   :  { %v674_v57 = vadd.f32 1.0, %v3092_v56 }
 0x44c   :  { %v3094_v2 = vpop.eup %3093 }
 0x44d   :  { %v575_v3 = vadd.f32 1.0, %v3094_v2  ;;  %3095 = vrcp.f32 %v674_v57 }
 0x44f   :  { %3097 = vrcp.f32 %v575_v3 }
 0x45a   :  { %v3096_v4 = vpop.eup %3095 }
 0x45b   :  { %v677_v6 = vadd.f32 %v3096_v4, %v3096_v4 }
 0x45c   :  { %v3098_v8 = vpop.eup %3097 }
 0x45d   :  { %v2607_v10 = vadd.f32 -1.0, %v677_v6  ;;  %v578_v14 = vadd.f32 %v3098_v8, %v3098_v8 }
 0x45f   :  { %v679_v16 = vsel %vm3400_vm4, %v2607_v10, %v3096_v4  ;;  %v2604_v17 = vadd.f32 -1.0, %v578_v14 }
 0x460   :  { %682 = vrot.lane.b32.xlu1 %v679_v16, %s3246_s17  ;;  %v680_v23 = vmul.f32 %v679_v16, %v3424_v49 }
 0x461   :  { %v580_v18 = vsel %vm3400_vm4, %v2604_v17, %v3098_v8 }
 0x462   :  { %583 = vrot.lane.b32.xlu0 %v580_v18, %s3246_s17  ;;  %v581_v26 = vmul.f32 0.0, %v580_v18 }
 0x4d2   :  { %v683_v19 = vpop.permute.xlu1 %682 }
 0x4d3   :  { %v685_v20 = vmul.f32 %v683_v19, %v679_v16 }
 0x4d4   :  { %v584_v21 = vpop.permute.xlu0 %583 }
 0x4d5   :  { %v586_v22 = vmul.f32 %v584_v21, %v580_v18  ;;  %687 = vrot.lane.b32.xlu1 %v685_v20, %s3247_s18 }
 0x4d7   :  { %588 = vrot.lane.b32.xlu0 %v586_v22, %s3247_s18 }
 0x547   :  { %v688_v24 = vpop.permute.xlu1 %687 }
 0x548   :  { %v3557_v25 = vadd.f32 %v688_v24, %v680_v23 }
 0x549   :  { %v589_v29 = vpop.permute.xlu0 %588 }
 0x54a   :  { %3099 = vtanh.f32 %v3557_v25  ;;  %v3560_v30 = vadd.f32 %v589_v29, %v581_v26 }
 0x54c   :  { %3101 = vtanh.f32 %v3560_v30 }
 0x557   :  { %v3100_v31 = vpop.eup %3099 }
 0x558   :  { %693 = vrot.lane.b32.xlu1 %v3100_v31, %s3246_s17 }
 0x559   :  { %v3102_v33 = vpop.eup %3101 }
 0x55a   :  { %594 = vrot.lane.b32.xlu0 %v3102_v33, %s3246_s17 }
 0x5ca   :  { %v694_v34 = vpop.permute.xlu1 %693 }
 0x5cb   :  { %v696_v35 = vmul.f32 %v694_v34, %v679_v16 }
 0x5cc   :  { %v595_v49 = vpop.permute.xlu0 %594 }
 0x5cd   :  { %v597_v36 = vmul.f32 %v595_v49, %v580_v18  ;;  %773 = vrot.lane.b32.xlu1 %v696_v35, %s3247_s18 }
 0x5cf   :  { %698 = vrot.lane.b32.xlu0 %v597_v36, %s3247_s18 }
 0x63f   :  { %v774_v41 = vpop.permute.xlu1 %773 }
 0x640   :  { %2873 = vmatmul.mubr.msk.f32.vlgmr.msra.gmra.mxu1 %vm168_vm1, %v774_v41 }
 0x641   :  { %v699_v43 = vpop.permute.xlu0 %698  ;;  %2887 = vmatpush3.msra.mxu1 %v3442_v59  ;;  %2894 = vmatprep.mubr.msk.f32.mxu1 %vm3245_vm0, %v3244_v5 }
 0x642   :  { %2862 = vmatmul.mubr.msk.f32.vlgmr.msra.gmra.mxu0 %vm168_vm1, %v699_v43  ;;  %2888 = vmatprep.subr.mxu1 %v3244_v5 }
 0x643   :  { %2876 = vmatpush3.msra.mxu0 %v3339_v7  ;;  %2883 = vmatprep.mubr.msk.f32.mxu0 %vm3245_vm0, %v3244_v5 }
 0x644   :  { %2877 = vmatprep.subr.mxu0 %v3244_v5  ;;  %2889 = vmatpush3.msra.mxu1 %v3444_v60 }
 0x645   :  { %2878 = vmatpush3.msra.mxu0 %v3348_v9  ;;  %2890 = vmatprep.subr.mxu1 %v3244_v5 }
 0x646   :  { %2879 = vmatprep.subr.mxu0 %v3244_v5  ;;  %2891 = vmatpush3.msra.mxu1 %v3452_v62 }
 0x647   :  { %2880 = vmatpush3.msra.mxu0 %v3357_v11  ;;  %2892 = vmatprep.subr.mxu1 %v3244_v5 }
 0x648   :  { %2881 = vmatprep.subr.mxu0 %v3244_v5  ;;  %2893 = vmatpush3.msra.mxu1 %v3459_v0 }
 0x649   :  { %2882 = vmatpush3.msra.mxu0 %v3364_v12  ;;  %2908 = vmatprep.subr.mxu1 %v3244_v5 }
 0x64a   :  { %2884 = vmatmul.mubr.msk.f32.vlgmr.msra.gmra.mxu0 %vm168_vm1, %v774_v41  ;;  %2897 = vmatprep.subr.mxu0 %v3244_v5 }
 0x64b   :  { %2898 = vmatpush3.msra.mxu0 %v3440_v58  ;;  %2905 = vmatprep.mubr.msk.f32.mxu0 %vm3245_vm0, %v3244_v5 }
 0x64c   :  { %2899 = vmatprep.subr.mxu0 %v3244_v5 }
 0x64d   :  { %2900 = vmatpush3.msra.mxu0 %v3448_v61 }
 0x64e   :  { %2901 = vmatprep.subr.mxu0 %v3244_v5 }
 0x64f   :  { %2902 = vmatpush3.msra.mxu0 %v3454_v63 }
 0x650   :  { %2903 = vmatprep.subr.mxu0 %v3244_v5 }
 0x651   :  { %2904 = vmatpush3.msra.mxu0 %v3462_v1 }
 0x652   :  { %2919 = vmatprep.subr.mxu0 %v3244_v5 }
 0x700   :  { %v843_v44 = vpop.f32.mrf.mxu1 }
 0x702   :  { %v768_v45 = vpop.f32.mrf.mxu0  ;;  %v2874_v46 = vpop.f32.mrf.mxu1 }
 0x703   :  { %v844_v47 = vadd.f32 %v843_v44, %v768_v45 }
 0x704   :  { %v2863_v48 = vpop.f32.mrf.mxu0 }
 0x705   :  { %v847_v50 = vadd.f32 %v3541_v42, %v844_v47 }
 0x707   :  { %v848_v51 = vadd.f32 %v847_v50, %v847_v50 }
 0x709   :  { %v849_v53 = vsel %vm3400_vm4, %v848_v51, %v847_v50  ;;  %v275_v51 = vadd.f32 %v3524_v13, %v3397_v28 }
 0x70a   :  { %v2610_v54 = vmul.f32 -1.442695, %v849_v53  ;;  %v942_v27 = vpop.f32.mrf.mxu0 }
 0x70b   :  { %v946_v55 = vadd.f32 %v942_v27, %v270_v52 }
 0x70c   :  { %3103 = vpow2.f32 %v2610_v54  ;;  %v2885_v56 = vpop.f32.mrf.mxu0 }
 0x70d   :  { %v947_v57 = vadd.f32 %v946_v55, %v946_v55 }
 0x70f   :  { %v948_v2 = vsel %vm3400_vm4, %v947_v57, %v946_v55 }
 0x710   :  { %v2613_v3 = vmul.f32 -1.442695, %v948_v2 }
 0x712   :  { %3105 = vpow2.f32 %v2613_v3 }
 0x719   :  { %v3104_v4 = vpop.eup %3103 }
 0x71a   :  { %v853_v6 = vadd.f32 1.0, %v3104_v4 }
 0x71c   :  { %3107 = vrcp.f32 %v853_v6 }
 0x71f   :  { %v3106_v8 = vpop.eup %3105 }
 0x720   :  { %v952_v10 = vadd.f32 1.0, %v3106_v8 }
 0x722   :  { %3109 = vrcp.f32 %v952_v10 }
 0x729   :  { %v3108_v15 = vpop.eup %3107 }
 0x72a   :  { %v856_v14 = vadd.f32 %v3108_v15, %v3108_v15 }
 0x72c   :  { %v2611_v16 = vadd.f32 -1.0, %v856_v14 }
 0x72e   :  { %v858_v17 = vsel %vm3400_vm4, %v2611_v16, %v3108_v15 }
 0x72f   :  { %v3110_v18 = vpop.eup %3109  ;;  %861 = vrot.lane.b32.xlu0 %v858_v17, %s3246_s17  ;;  %v859_v29 = vmul.f32 %v858_v17, %v3560_v30 }
 0x730   :  { %v955_v19 = vadd.f32 %v3110_v18, %v3110_v18 }
 0x732   :  { %v2614_v20 = vadd.f32 -1.0, %v955_v19 }
 0x734   :  { %v957_v21 = vsel %vm3400_vm4, %v2614_v20, %v3110_v18 }
 0x735   :  { %960 = vrot.lane.b32.xlu1 %v957_v21, %s3246_s17  ;;  %v958_v34 = vmul.f32 %v957_v21, %v3557_v25 }
 0x7a1   :  { %v862_v22 = vpop.permute.xlu0 %861 }
 0x7a2   :  { %v864_v23 = vmul.f32 %v862_v22, %v858_v17 }
 0x7a4   :  { %866 = vrot.lane.b32.xlu0 %v864_v23, %s3247_s18 }
 0x7a7   :  { %v961_v24 = vpop.permute.xlu1 %960 }
 0x7a8   :  { %v963_v26 = vmul.f32 %v961_v24, %v957_v21 }
 0x7aa   :  { %965 = vrot.lane.b32.xlu1 %v963_v26, %s3247_s18 }
 0x816   :  { %v867_v31 = vpop.permute.xlu0 %866 }
 0x817   :  { %v3616_v33 = vadd.f32 %v867_v31, %v859_v29 }
 0x819   :  { %3111 = vtanh.f32 %v3616_v33 }
 0x81c   :  { %v966_v35 = vpop.permute.xlu1 %965 }
 0x81d   :  { %v3620_v49 = vadd.f32 %v966_v35, %v958_v34 }
 0x81f   :  { %3113 = vtanh.f32 %v3620_v49 }
 0x826   :  { %v3112_v36 = vpop.eup %3111 }
 0x827   :  { %872 = vrot.lane.b32.xlu0 %v3112_v36, %s3246_s17 }
 0x82c   :  { %v3114_v41 = vpop.eup %3113 }
 0x82d   :  { %971 = vrot.lane.b32.xlu1 %v3114_v41, %s3246_s17 }
 0x899   :  { %v873_v43 = vpop.permute.xlu0 %872 }
 0x89a   :  { %v875_v30 = vmul.f32 %v873_v43, %v858_v17 }
 0x89c   :  { %976 = vrot.lane.b32.xlu0 %v875_v30, %s3247_s18 }
 0x89f   :  { %v972_v44 = vpop.permute.xlu1 %971 }
 0x8a0   :  { %v974_v45 = vmul.f32 %v972_v44, %v957_v21 }
 0x8a2   :  { %1051 = vrot.lane.b32.xlu1 %v974_v45, %s3247_s18 }
 0x90e   :  { %v977_v25 = vpop.permute.xlu0 %976 }
 0x90f   :  { %2895 = vmatmul.mubr.msk.f32.vlgmr.msra.gmra.mxu1 %vm168_vm1, %v977_v25 }
 0x910   :  { %2909 = vmatpush3.msra.mxu1 %v3339_v7  ;;  %2916 = vmatprep.mubr.msk.f32.mxu1 %vm3245_vm0, %v3244_v5 }
 0x911   :  { %2910 = vmatprep.subr.mxu1 %v3244_v5 }
 0x912   :  { %2911 = vmatpush3.msra.mxu1 %v3348_v9 }
 0x913   :  { %2912 = vmatprep.subr.mxu1 %v3244_v5 }
 0x914   :  { %2913 = vmatpush3.msra.mxu1 %v3357_v11  ;;  %v1052_v46 = vpop.permute.xlu1 %1051 }
 0x915   :  { %2906 = vmatmul.mubr.msk.f32.vlgmr.msra.gmra.mxu0 %vm168_vm1, %v1052_v46  ;;  %2914 = vmatprep.subr.mxu1 %v3244_v5 }
 0x916   :  { %2915 = vmatpush3.msra.mxu1 %v3364_v12  ;;  %2920 = vmatpush3.msra.mxu0 %v3442_v59 }
 0x917   :  { %2917 = vmatmul.mubr.msk.f32.vlgmr.msra.gmra.mxu1 %vm168_vm1, %v1052_v46  ;;  %2930 = vmatprep.subr.mxu1 %v3244_v5 }
 0x918   :  { %2921 = vmatprep.subr.mxu0 %v3244_v5  ;;  %2931 = vmatpush3.msra.mxu1 %v3440_v58 }
 0x919   :  { %2922 = vmatpush3.msra.mxu0 %v3444_v60  ;;  %2932 = vmatprep.subr.mxu1 %v3244_v5 }
 0x91a   :  { %2923 = vmatprep.subr.mxu0 %v3244_v5  ;;  %2933 = vmatpush3.msra.mxu1 %v3448_v61 }
 0x91b   :  { %2924 = vmatpush3.msra.mxu0 %v3452_v62  ;;  %2934 = vmatprep.subr.mxu1 %v3244_v5 }
 0x91c   :  { %2925 = vmatprep.subr.mxu0 %v3244_v5  ;;  %2935 = vmatpush3.msra.mxu1 %v3454_v63 }
 0x91d   :  { %2926 = vmatpush3.msra.mxu0 %v3459_v0  ;;  %2936 = vmatprep.subr.mxu1 %v3244_v5 }
 0x91e   :  { %2937 = vmatpush3.msra.mxu1 %v3462_v1  ;;  %2938 = vmatprep.mubr.msk.f32.mxu1 %vm3245_vm0, %v3244_v5 }
 0x91f   :  { %2927 = vmatprep.mubr.msk.f32.mxu0 %vm3245_vm0, %v3244_v5  ;;  %2941 = vmatprep.subr.mxu0 %v3244_v5 }
 0x920   :  { %2952 = vmatprep.subr.mxu1 %v3244_v5 }
 0x9cf   :  { %v1046_v47 = vpop.f32.mrf.mxu1 }
 0x9d1   :  { %v2896_v48 = vpop.f32.mrf.mxu1 }
 0x9d5   :  { %v1121_v50 = vpop.f32.mrf.mxu0 }
 0x9d6   :  { %v1122_v52 = vadd.f32 %v1121_v50, %v1046_v47 }
 0x9d7   :  { %v2907_v53 = vpop.f32.mrf.mxu0  ;;  %v1220_v54 = vpop.f32.mrf.mxu1 }
 0x9d8   :  { %v1125_v27 = vadd.f32 %v3541_v42, %v1122_v52  ;;  %v1224_v55 = vadd.f32 %v1220_v54, %v275_v51 }
 0x9d9   :  { %v2918_v56 = vpop.f32.mrf.mxu1 }
 0x9da   :  { %v1126_v57 = vadd.f32 %v1125_v27, %v1125_v27  ;;  %v1225_v2 = vadd.f32 %v1224_v55, %v1224_v55 }
 0x9dc   :  { %v1127_v3 = vsel %vm3400_vm4, %v1126_v57, %v1125_v27  ;;  %v1226_v4 = vsel %vm3400_vm4, %v1225_v2, %v1224_v55  ;;  %v280_v27 = vadd.f32 %v3397_v28, %v3530_v38 }
 0x9dd   :  { %v2617_v6 = vmul.f32 -1.442695, %v1127_v3  ;;  %v2620_v8 = vmul.f32 -1.442695, %v1226_v4 }
 0x9df   :  { %3115 = vpow2.f32 %v2617_v6 }
 0x9e0   :  { %3117 = vpow2.f32 %v2620_v8 }
 0x9ec   :  { %v3116_v13 = vpop.eup %3115 }
 0x9ed   :  { %v3118_v10 = vpop.eup %3117  ;;  %v1131_v15 = vadd.f32 1.0, %v3116_v13 }
 0x9ee   :  { %v1230_v14 = vadd.f32 1.0, %v3118_v10 }
 0x9ef   :  { %3119 = vrcp.f32 %v1131_v15 }
 0x9f0   :  { %3121 = vrcp.f32 %v1230_v14 }
 0x9fc   :  { %v3120_v16 = vpop.eup %3119 }
 0x9fd   :  { %v3122_v17 = vpop.eup %3121  ;;  %v1134_v18 = vadd.f32 %v3120_v16, %v3120_v16 }
 0x9fe   :  { %v1233_v19 = vadd.f32 %v3122_v17, %v3122_v17 }
 0x9ff   :  { %v2618_v20 = vadd.f32 -1.0, %v1134_v18 }
 0xa00   :  { %v2621_v21 = vadd.f32 -1.0, %v1233_v19 }
 0xa01   :  { %v1136_v22 = vsel %vm3400_vm4, %v2618_v20, %v3120_v16 }
 0xa02   :  { %v1235_v23 = vsel %vm3400_vm4, %v2621_v21, %v3122_v17  ;;  %1139 = vrot.lane.b32.xlu0 %v1136_v22, %s3246_s17  ;;  %v1137_v34 = vmul.f32 %v1136_v22, %v3616_v33 }
 0xa03   :  { %1238 = vrot.lane.b32.xlu1 %v1235_v23, %s3246_s17  ;;  %v1236_v35 = vmul.f32 %v1235_v23, %v3620_v49 }
 0xa74   :  { %v1140_v24 = vpop.permute.xlu0 %1139 }
 0xa75   :  { %v1239_v26 = vpop.permute.xlu1 %1238  ;;  %v1142_v29 = vmul.f32 %v1140_v24, %v1136_v22 }
 0xa76   :  { %v1241_v31 = vmul.f32 %v1239_v26, %v1235_v23 }
 0xa77   :  { %1144 = vrot.lane.b32.xlu0 %v1142_v29, %s3247_s18 }
 0xa78   :  { %1243 = vrot.lane.b32.xlu1 %v1241_v31, %s3247_s18 }
 0xae9   :  { %v1145_v36 = vpop.permute.xlu0 %1144 }
 0xaea   :  { %v1244_v41 = vpop.permute.xlu1 %1243  ;;  %v3677_v43 = vadd.f32 %v1145_v36, %v1137_v34 }
 0xaeb   :  { %v3679_v30 = vadd.f32 %v1244_v41, %v1236_v35 }
 0xaec   :  { %3123 = vtanh.f32 %v3677_v43 }
 0xaed   :  { %3125 = vtanh.f32 %v3679_v30 }
 0xaf9   :  { %v3124_v44 = vpop.eup %3123 }
 0xafa   :  { %v3126_v45 = vpop.eup %3125  ;;  %1150 = vrot.lane.b32.xlu0 %v3124_v44, %s3246_s17 }
 0xafb   :  { %1249 = vrot.lane.b32.xlu1 %v3126_v45, %s3246_s17 }
 0xb6c   :  { %v1151_v25 = vpop.permute.xlu0 %1150 }
 0xb6d   :  { %v1250_v33 = vpop.permute.xlu1 %1249  ;;  %v1153_v46 = vmul.f32 %v1151_v25, %v1136_v22 }
 0xb6e   :  { %v1252_v49 = vmul.f32 %v1250_v33, %v1235_v23 }
 0xb6f   :  { %1254 = vrot.lane.b32.xlu0 %v1153_v46, %s3247_s18 }
 0xb70   :  { %1329 = vrot.lane.b32.xlu1 %v1252_v49, %s3247_s18 }
 0xbe1   :  { %v1255_v47 = vpop.permute.xlu0 %1254 }
 0xbe2   :  { %v1330_v48 = vpop.permute.xlu1 %1329  ;;  %2928 = vmatmul.mubr.msk.f32.vlgmr.msra.gmra.mxu0 %vm168_vm1, %v1255_v47  ;;  %v3751_v47 = vld [vmem:[%s3986_s4 + $0x18] sm:$0xff] }
 0xbe3   :  { %2939 = vmatmul.mubr.msk.f32.vlgmr.msra.gmra.mxu1 %vm168_vm1, %v1330_v48  ;;  %2942 = vmatpush3.msra.mxu0 %v3339_v7 }
 0xbe4   :  { %2943 = vmatprep.subr.mxu0 %v3244_v5  ;;  %2949 = vmatprep.mubr.msk.f32.mxu0 %vm3245_vm0, %v3244_v5 }
 0xbe5   :  { %2944 = vmatpush3.msra.mxu0 %v3348_v9  ;;  %2953 = vmatpush3.msra.mxu1 %v3442_v59 }
 0xbe6   :  { %2945 = vmatprep.subr.mxu0 %v3244_v5  ;;  %2954 = vmatprep.subr.mxu1 %v3244_v5 }
 0xbe7   :  { %2946 = vmatpush3.msra.mxu0 %v3357_v11  ;;  %2955 = vmatpush3.msra.mxu1 %v3444_v60 }
 0xbe8   :  { %2947 = vmatprep.subr.mxu0 %v3244_v5  ;;  %2956 = vmatprep.subr.mxu1 %v3244_v5 }
 0xbe9   :  { %2948 = vmatpush3.msra.mxu0 %v3364_v12  ;;  %2957 = vmatpush3.msra.mxu1 %v3452_v62 }
 0xbea   :  { %2950 = vmatmul.mubr.msk.f32.vlgmr.msra.gmra.mxu0 %vm168_vm1, %v1330_v48  ;;  %2958 = vmatprep.subr.mxu1 %v3244_v5  ;;  %v3760_v48 = vld [vmem:[%s3986_s4 + $0x10] sm:$0xff] }
 0xbeb   :  { %2963 = vmatprep.subr.mxu0 %v3244_v5  ;;  %2959 = vmatpush3.msra.mxu1 %v3459_v0 }
 0xbec   :  { %2964 = vmatpush3.msra.mxu0 %v3440_v58  ;;  %2960 = vmatprep.mubr.msk.f32.mxu1 %vm3245_vm0, %v3244_v5 }
 0xbed   :  { %2965 = vmatprep.subr.mxu0 %v3244_v5  ;;  %2974 = vmatprep.subr.mxu1 %v3244_v5 }
 0xbee   :  { %2966 = vmatpush3.msra.mxu0 %v3448_v61  ;;  %2971 = vmatprep.mubr.msk.f32.mxu0 %vm3245_vm0, %v3244_v5 }
 0xbef   :  { %2967 = vmatprep.subr.mxu0 %v3244_v5 }
 0xbf0   :  { %2968 = vmatpush3.msra.mxu0 %v3454_v63 }
 0xbf1   :  { %2969 = vmatprep.subr.mxu0 %v3244_v5 }
 0xbf2   :  { %2970 = vmatpush3.msra.mxu0 %v3462_v1 }
 0xbf3   :  { %2985 = vmatprep.subr.mxu0 %v3244_v5 }
 0xca2   :  { %v1324_v7 = vpop.f32.mrf.mxu0 }
 0xca3   :  { %v1399_v9 = vpop.f32.mrf.mxu1 }
 0xca4   :  { %v1400_v50 = vadd.f32 %v1399_v9, %v1324_v7  ;;  %v2929_v51 = vpop.f32.mrf.mxu0 }
 0xca5   :  { %v2940_v52 = vpop.f32.mrf.mxu1 }
 0xca6   :  { %v1403_v53 = vadd.f32 %v3541_v42, %v1400_v50 }
 0xca8   :  { %v1404_v54 = vadd.f32 %v1403_v53, %v1403_v53 }
 0xcaa   :  { %v1405_v55 = vsel %vm3400_vm4, %v1404_v54, %v1403_v53  ;;  %v1498_v56 = vpop.f32.mrf.mxu0 }
 0xcab   :  { %v2624_v57 = vmul.f32 -1.442695, %v1405_v55  ;;  %v1502_v2 = vadd.f32 %v1498_v56, %v280_v27 }
 0xcac   :  { %v2951_v3 = vpop.f32.mrf.mxu0 }
 0xcad   :  { %3127 = vpow2.f32 %v2624_v57  ;;  %v1503_v4 = vadd.f32 %v1502_v2, %v1502_v2 }
 0xcaf   :  { %v1504_v6 = vsel %vm3400_vm4, %v1503_v4, %v1502_v2 }
 0xcb0   :  { %v2627_v8 = vmul.f32 -1.442695, %v1504_v6 }
 0xcb2   :  { %3129 = vpow2.f32 %v2627_v8 }
 0xcba   :  { %v3128_v13 = vpop.eup %3127 }
 0xcbb   :  { %v1409_v10 = vadd.f32 1.0, %v3128_v13 }
 0xcbd   :  { %3131 = vrcp.f32 %v1409_v10 }
 0xcbf   :  { %v3130_v15 = vpop.eup %3129 }
 0xcc0   :  { %v1508_v14 = vadd.f32 1.0, %v3130_v15 }
 0xcc2   :  { %3133 = vrcp.f32 %v1508_v14 }
 0xcca   :  { %v3132_v38 = vpop.eup %3131 }
 0xccb   :  { %v1412_v16 = vadd.f32 %v3132_v38, %v3132_v38 }
 0xccd   :  { %v2625_v17 = vadd.f32 -1.0, %v1412_v16 }
 0xccf   :  { %v3134_v18 = vpop.eup %3133  ;;  %v1414_v19 = vsel %vm3400_vm4, %v2625_v17, %v3132_v38 }
 0xcd0   :  { %1417 = vrot.lane.b32.xlu0 %v1414_v19, %s3246_s17  ;;  %v1511_v20 = vadd.f32 %v3134_v18, %v3134_v18  ;;  %v1415_v31 = vmul.f32 %v1414_v19, %v3677_v43 }
 0xcd2   :  { %v2628_v21 = vadd.f32 -1.0, %v1511_v20 }
 0xcd4   :  { %v1513_v22 = vsel %vm3400_vm4, %v2628_v21, %v3134_v18 }
 0xcd5   :  { %1516 = vrot.lane.b32.xlu1 %v1513_v22, %s3246_s17  ;;  %v1514_v36 = vmul.f32 %v1513_v22, %v3679_v30 }
 0xd42   :  { %v1418_v23 = vpop.permute.xlu0 %1417 }
 0xd43   :  { %v1420_v24 = vmul.f32 %v1418_v23, %v1414_v19 }
 0xd45   :  { %1422 = vrot.lane.b32.xlu0 %v1420_v24, %s3247_s18 }
 0xd47   :  { %v1517_v26 = vpop.permute.xlu1 %1516 }
 0xd48   :  { %v1519_v29 = vmul.f32 %v1517_v26, %v1513_v22 }
 0xd4a   :  { %1521 = vrot.lane.b32.xlu1 %v1519_v29, %s3247_s18 }
 0xdb7   :  { %v1423_v34 = vpop.permute.xlu0 %1422 }
 0xdb8   :  { %v3736_v35 = vadd.f32 %v1423_v34, %v1415_v31 }
 0xdba   :  { %3135 = vtanh.f32 %v3736_v35 }
 0xdbc   :  { %v1522_v41 = vpop.permute.xlu1 %1521 }
 0xdbd   :  { %v3740_v44 = vadd.f32 %v1522_v41, %v1514_v36  ;;  %v3824_v36 = vld [vmem:[#allocation5 + $0x18] sm:$0xff]  ;;  %v3832_v41 = vld [vmem:[%s3986_s4 + $0x8] sm:$0xff] }
 0xdbf   :  { %3137 = vtanh.f32 %v3740_v44 }
 0xdc7   :  { %v3136_v45 = vpop.eup %3135 }
 0xdc8   :  { %1428 = vrot.lane.b32.xlu0 %v3136_v45, %s3246_s17  ;;  %v3843_v45 = vld [vmem:[%s3986_s4] sm:$0xff] }
 0xdcc   :  { %v3138_v25 = vpop.eup %3137 }
 0xdcd   :  { %1527 = vrot.lane.b32.xlu1 %v3138_v25, %s3246_s17  ;;  %v3846_v25 = vld [vmem:[#allocation5 + $0x8] sm:$0xff] }
 0xe3a   :  { %v1429_v33 = vpop.permute.xlu0 %1428 }
 0xe3b   :  { %v1431_v43 = vmul.f32 %v1429_v33, %v1414_v19  ;;  %v3852_v33 = vld [vmem:[#allocation5] sm:$0xff] }
 0xe3d   :  { %1532 = vrot.lane.b32.xlu0 %v1431_v43, %s3247_s18  ;;  %v3855_v43 = vld [vmem:[#allocation3 + $0x18] sm:$0xff] }
 0xe3f   :  { %v1528_v46 = vpop.permute.xlu1 %1527 }
 0xe40   :  { %v1530_v49 = vmul.f32 %v1528_v46, %v1513_v22  ;;  %v3862_v46 = vld [vmem:[#allocation3 + $0x10] sm:$0xff] }
 0xe42   :  { %1607 = vrot.lane.b32.xlu1 %v1530_v49, %s3247_s18  ;;  %v3868_v49 = vld [vmem:[#allocation3 + $0x8] sm:$0xff] }
 0xeaf   :  { %v1533_v30 = vpop.permute.xlu0 %1532 }
 0xeb0   :  { %2961 = vmatmul.mubr.msk.f32.vlgmr.msra.gmra.mxu1 %vm168_vm1, %v1533_v30  ;;  %v3872_v30 = vld [vmem:[#allocation3] sm:$0xff] }
 0xeb1   :  { %2975 = vmatpush3.msra.mxu1 %v3751_v47  ;;  %2982 = vmatprep.mubr.msk.f32.mxu1 %vm3245_vm0, %v3244_v5 }
 0xeb2   :  { %2976 = vmatprep.subr.mxu1 %v3244_v5 }
 0xeb3   :  { %2977 = vmatpush3.msra.mxu1 %v3760_v48 }
 0xeb4   :  { %2978 = vmatprep.subr.mxu1 %v3244_v5  ;;  %v1608_v7 = vpop.permute.xlu1 %1607 }
 0xeb5   :  { %2979 = vmatpush3.msra.mxu1 %v3357_v11  ;;  %2972 = vmatmul.mubr.msk.f32.vlgmr.msra.gmra.mxu0 %vm168_vm1, %v1608_v7 }
 0xeb6   :  { %2980 = vmatprep.subr.mxu1 %v3244_v5  ;;  %2986 = vmatpush3.msra.mxu0 %v3442_v59 }
 0xeb7   :  { %2981 = vmatpush3.msra.mxu1 %v3364_v12  ;;  %2987 = vmatprep.subr.mxu0 %v3244_v5 }
 0xeb8   :  { %2983 = vmatmul.mubr.msk.f32.vlgmr.msra.gmra.mxu1 %vm168_vm1, %v1608_v7  ;;  %2996 = vmatprep.subr.mxu1 %v3244_v5 }
 0xeb9   :  { %2997 = vmatpush3.msra.mxu1 %v3440_v58  ;;  %2988 = vmatpush3.msra.mxu0 %v3444_v60  ;;  %v285_v60 = vadd.f32 %v3528_v37, %v3397_v28 }
 0xeba   :  { %2998 = vmatprep.subr.mxu1 %v3244_v5  ;;  %2989 = vmatprep.subr.mxu0 %v3244_v5 }
 0xebb   :  { %2999 = vmatpush3.msra.mxu1 %v3448_v61  ;;  %2990 = vmatpush3.msra.mxu0 %v3452_v62 }
 0xebc   :  { %3000 = vmatprep.subr.mxu1 %v3244_v5  ;;  %2991 = vmatprep.subr.mxu0 %v3244_v5 }
 0xebd   :  { %3001 = vmatpush3.msra.mxu1 %v3454_v63  ;;  %2992 = vmatpush3.msra.mxu0 %v3459_v0 }
 0xebe   :  { %3002 = vmatprep.subr.mxu1 %v3244_v5  ;;  %3004 = vmatprep.mubr.msk.f32.mxu1 %vm3245_vm0, %v3244_v5 }
 0xebf   :  { %3003 = vmatpush3.msra.mxu1 %v3462_v1  ;;  %2993 = vmatprep.mubr.msk.f32.mxu0 %vm3245_vm0, %v3244_v5 }
 0xec0   :  { %3007 = vmatprep.subr.mxu0 %v3244_v5  ;;  %3018 = vmatprep.subr.mxu1 %v3244_v5 }
 0xf70   :  { %v1602_v11 = vpop.f32.mrf.mxu1 }
 0xf72   :  { %v2962_v12 = vpop.f32.mrf.mxu1 }
 0xf75   :  { %v1677_v58 = vpop.f32.mrf.mxu0 }
 0xf76   :  { %v1678_v59 = vadd.f32 %v1677_v58, %v1602_v11 }
 0xf77   :  { %v2973_v61 = vpop.f32.mrf.mxu0 }
 0xf78   :  { %v1681_v62 = vadd.f32 %v3541_v42, %v1678_v59  ;;  %v1776_v63 = vpop.f32.mrf.mxu1 }
 0xf79   :  { %v1780_v0 = vadd.f32 %v1776_v63, %v285_v60 }
 0xf7a   :  { %v1682_v1 = vadd.f32 %v1681_v62, %v1681_v62  ;;  %v2984_v9 = vpop.f32.mrf.mxu1 }
 0xf7b   :  { %v1781_v50 = vadd.f32 %v1780_v0, %v1780_v0 }
 0xf7c   :  { %v1683_v51 = vsel %vm3400_vm4, %v1682_v1, %v1681_v62  ;;  %v3880_v62 = vld [vmem:[%s3987_s5] ss:$0 sm:$0xff] }
 0xf7d   :  { %v2631_v52 = vmul.f32 -1.442695, %v1683_v51  ;;  %v1782_v53 = vsel %vm3400_vm4, %v1781_v50, %v1780_v0  ;;  %v290_v63 = vadd.f32 %v3880_v62, %v3534_v40 }
 0xf7e   :  { %v2634_v54 = vmul.f32 -1.442695, %v1782_v53 }
 0xf7f   :  { %3139 = vpow2.f32 %v2631_v52 }
 0xf80   :  { %3141 = vpow2.f32 %v2634_v54 }
 0xf8c   :  { %v3140_v27 = vpop.eup %3139 }
 0xf8d   :  { %v3142_v28 = vpop.eup %3141  ;;  %v1687_v37 = vadd.f32 1.0, %v3140_v27 }
 0xf8e   :  { %v1786_v55 = vadd.f32 1.0, %v3142_v28 }
 0xf8f   :  { %3143 = vrcp.f32 %v1687_v37 }
 0xf90   :  { %3145 = vrcp.f32 %v1786_v55 }
 0xf9c   :  { %v3144_v56 = vpop.eup %3143 }
 0xf9d   :  { %v3146_v57 = vpop.eup %3145  ;;  %v1690_v2 = vadd.f32 %v3144_v56, %v3144_v56 }
 0xf9e   :  { %v1789_v3 = vadd.f32 %v3146_v57, %v3146_v57 }
 0xf9f   :  { %v2632_v4 = vadd.f32 -1.0, %v1690_v2 }
 0xfa0   :  { %v2635_v6 = vadd.f32 -1.0, %v1789_v3 }
 0xfa1   :  { %v1692_v8 = vsel %vm3400_vm4, %v2632_v4, %v3144_v56 }
 0xfa2   :  { %v1791_v13 = vsel %vm3400_vm4, %v2635_v6, %v3146_v57  ;;  %1695 = vrot.lane.b32.xlu0 %v1692_v8, %s3246_s17  ;;  %v1693_v16 = vmul.f32 %v1692_v8, %v3736_v35 }
 0xfa3   :  { %1794 = vrot.lane.b32.xlu1 %v1791_v13, %s3246_s17  ;;  %v1792_v17 = vmul.f32 %v1791_v13, %v3740_v44  ;;  %v3835_v44 = vld [vmem:[#allocation5 + $0x10] sm:$0xff] }
0x1014   :  { %v1696_v10 = vpop.permute.xlu0 %1695 }
0x1015   :  { %v1795_v15 = vpop.permute.xlu1 %1794  ;;  %v1698_v14 = vmul.f32 %v1696_v10, %v1692_v8 }
0x1016   :  { %v1797_v38 = vmul.f32 %v1795_v15, %v1791_v13 }
0x1017   :  { %1700 = vrot.lane.b32.xlu0 %v1698_v14, %s3247_s18 }
0x1018   :  { %1799 = vrot.lane.b32.xlu1 %v1797_v38, %s3247_s18 }
0x1089   :  { %v1701_v18 = vpop.permute.xlu0 %1700 }
0x108a   :  { %v1800_v19 = vpop.permute.xlu1 %1799  ;;  %v3807_v20 = vadd.f32 %v1701_v18, %v1693_v16 }
0x108b   :  { %v3809_v21 = vadd.f32 %v1800_v19, %v1792_v17 }
0x108c   :  { %3147 = vtanh.f32 %v3807_v20 }
0x108d   :  { %3149 = vtanh.f32 %v3809_v21 }
0x1099   :  { %v3148_v22 = vpop.eup %3147 }
0x109a   :  { %v3150_v23 = vpop.eup %3149  ;;  %1706 = vrot.lane.b32.xlu0 %v3148_v22, %s3246_s17 }
0x109b   :  { %1805 = vrot.lane.b32.xlu1 %v3150_v23, %s3246_s17 }
0x110c   :  { %v1707_v24 = vpop.permute.xlu0 %1706 }
0x110d   :  { %v1806_v26 = vpop.permute.xlu1 %1805  ;;  %v1709_v29 = vmul.f32 %v1707_v24, %v1692_v8 }
0x110e   :  { %v1808_v31 = vmul.f32 %v1806_v26, %v1791_v13 }
0x110f   :  { %1810 = vrot.lane.b32.xlu0 %v1709_v29, %s3247_s18 }
0x1110   :  { %1885 = vrot.lane.b32.xlu1 %v1808_v31, %s3247_s18 }
0x1181   :  { %v1811_v34 = vpop.permute.xlu0 %1810 }
0x1182   :  { %v1886_v35 = vpop.permute.xlu1 %1885  ;;  %2994 = vmatmul.mubr.msk.f32.vlgmr.msra.gmra.mxu0 %vm168_vm1, %v1811_v34 }
0x1183   :  { %3005 = vmatmul.mubr.msk.f32.vlgmr.msra.gmra.mxu1 %vm168_vm1, %v1886_v35  ;;  %3008 = vmatpush3.msra.mxu0 %v3751_v47 }
0x1184   :  { %3009 = vmatprep.subr.mxu0 %v3244_v5  ;;  %3015 = vmatprep.mubr.msk.f32.mxu0 %vm3245_vm0, %v3244_v5 }
0x1185   :  { %3010 = vmatpush3.msra.mxu0 %v3760_v48  ;;  %3019 = vmatpush3.msra.mxu1 %v3824_v36 }
0x1186   :  { %3011 = vmatprep.subr.mxu0 %v3244_v5  ;;  %3020 = vmatprep.subr.mxu1 %v3244_v5 }
0x1187   :  { %3012 = vmatpush3.msra.mxu0 %v3832_v41  ;;  %3021 = vmatpush3.msra.mxu1 %v3835_v44 }
0x1188   :  { %3013 = vmatprep.subr.mxu0 %v3244_v5  ;;  %3022 = vmatprep.subr.mxu1 %v3244_v5 }
0x1189   :  { %3014 = vmatpush3.msra.mxu0 %v3843_v45  ;;  %3023 = vmatpush3.msra.mxu1 %v3846_v25 }
0x118a   :  { %3016 = vmatmul.mubr.msk.f32.vlgmr.msra.gmra.mxu0 %vm168_vm1, %v1886_v35  ;;  %3024 = vmatprep.subr.mxu1 %v3244_v5 }
0x118b   :  { %3029 = vmatprep.subr.mxu0 %v3244_v5  ;;  %3025 = vmatpush3.msra.mxu1 %v3852_v33 }
0x118c   :  { %3030 = vmatpush3.msra.mxu0 %v3855_v43  ;;  %3026 = vmatprep.mubr.msk.f32.mxu1 %vm3245_vm0, %v3244_v5 }
0x118d   :  { %3031 = vmatprep.subr.mxu0 %v3244_v5  ;;  %3040 = vmatprep.subr.mxu1 %v3244_v5 }
0x118e   :  { %3032 = vmatpush3.msra.mxu0 %v3862_v46  ;;  %3037 = vmatprep.mubr.msk.f32.mxu0 %vm3245_vm0, %v3244_v5 }
0x118f   :  { %3033 = vmatprep.subr.mxu0 %v3244_v5 }
0x1190   :  { %3034 = vmatpush3.msra.mxu0 %v3868_v49 }
0x1191   :  { %3035 = vmatprep.subr.mxu0 %v3244_v5 }
0x1192   :  { %3036 = vmatpush3.msra.mxu0 %v3872_v30 }
0x1193   :  { %3051 = vmatprep.subr.mxu0 %v3244_v5 }
0x1242   :  { %v1880_v7 = vpop.f32.mrf.mxu0 }
0x1243   :  { %v1955_v11 = vpop.f32.mrf.mxu1 }
0x1244   :  { %v1956_v12 = vadd.f32 %v1955_v11, %v1880_v7  ;;  %v2995_v58 = vpop.f32.mrf.mxu0 }
0x1245   :  { %v3006_v59 = vpop.f32.mrf.mxu1 }
0x1246   :  { %v1959_v60 = vadd.f32 %v3541_v42, %v1956_v12 }
0x1248   :  { %v1960_v61 = vadd.f32 %v1959_v60, %v1959_v60 }
0x124a   :  { %v1961_v0 = vsel %vm3400_vm4, %v1960_v61, %v1959_v60  ;;  %v2054_v1 = vpop.f32.mrf.mxu0 }
0x124b   :  { %v2638_v9 = vmul.f32 -1.442695, %v1961_v0  ;;  %v2058_v50 = vadd.f32 %v2054_v1, %v290_v63 }
0x124c   :  { %v3017_v51 = vpop.f32.mrf.mxu0 }
0x124d   :  { %3151 = vpow2.f32 %v2638_v9  ;;  %v2059_v52 = vadd.f32 %v2058_v50, %v2058_v50 }
0x124f   :  { %v2060_v42 = vsel %vm3400_vm4, %v2059_v52, %v2058_v50 }
0x1250   :  { %v2641_v53 = vmul.f32 -1.442695, %v2060_v42 }
0x1252   :  { %3153 = vpow2.f32 %v2641_v53 }
0x125a   :  { %v3152_v54 = vpop.eup %3151 }
0x125b   :  { %v1965_v27 = vadd.f32 1.0, %v3152_v54 }
0x125d   :  { %3155 = vrcp.f32 %v1965_v27 }
0x125f   :  { %v3154_v28 = vpop.eup %3153 }
0x1260   :  { %v2064_v37 = vadd.f32 1.0, %v3154_v28 }
0x1262   :  { %3157 = vrcp.f32 %v2064_v37 }
0x126a   :  { %v3156_v40 = vpop.eup %3155 }
0x126b   :  { %v1968_v55 = vadd.f32 %v3156_v40, %v3156_v40 }
0x126d   :  { %v2639_v56 = vadd.f32 -1.0, %v1968_v55 }
0x126f   :  { %v3158_v57 = vpop.eup %3157  ;;  %v1970_v2 = vsel %vm3400_vm4, %v2639_v56, %v3156_v40 }
0x1270   :  { %1973 = vrot.lane.b32.xlu0 %v1970_v2, %s3246_s17  ;;  %v2067_v3 = vadd.f32 %v3158_v57, %v3158_v57  ;;  %v1971_v14 = vmul.f32 %v1970_v2, %v3807_v20 }
0x1272   :  { %v2642_v4 = vadd.f32 -1.0, %v2067_v3 }
0x1274   :  { %v2069_v6 = vsel %vm3400_vm4, %v2642_v4, %v3158_v57 }
0x1275   :  { %2072 = vrot.lane.b32.xlu1 %v2069_v6, %s3246_s17  ;;  %v2070_v17 = vmul.f32 %v2069_v6, %v3809_v21 }
0x12e2   :  { %v1974_v8 = vpop.permute.xlu0 %1973 }
0x12e3   :  { %v1976_v13 = vmul.f32 %v1974_v8, %v1970_v2 }
0x12e5   :  { %1978 = vrot.lane.b32.xlu0 %v1976_v13, %s3247_s18 }
0x12e7   :  { %v2073_v10 = vpop.permute.xlu1 %2072 }
0x12e8   :  { %v2075_v15 = vmul.f32 %v2073_v10, %v2069_v6 }
0x12ea   :  { %2077 = vrot.lane.b32.xlu1 %v2075_v15, %s3247_s18 }
0x1357   :  { %v1979_v38 = vpop.permute.xlu0 %1978 }
0x1358   :  { %v3897_v16 = vadd.f32 %v1979_v38, %v1971_v14 }
0x135a   :  { %3159 = vtanh.f32 %v3897_v16 }
0x135c   :  { %v2078_v18 = vpop.permute.xlu1 %2077 }
0x135d   :  { %v3901_v19 = vadd.f32 %v2078_v18, %v2070_v17 }
0x135f   :  { %3161 = vtanh.f32 %v3901_v19 }
0x1367   :  { %v3160_v22 = vpop.eup %3159 }
0x1368   :  { %1984 = vrot.lane.b32.xlu0 %v3160_v22, %s3246_s17 }
0x136c   :  { %v3162_v23 = vpop.eup %3161 }
0x136d   :  { %2083 = vrot.lane.b32.xlu1 %v3162_v23, %s3246_s17 }
0x13da   :  { %v1985_v24 = vpop.permute.xlu0 %1984 }
0x13db   :  { %v1987_v20 = vmul.f32 %v1985_v24, %v1970_v2 }
0x13dd   :  { %2088 = vrot.lane.b32.xlu0 %v1987_v20, %s3247_s18 }
0x13df   :  { %v2084_v26 = vpop.permute.xlu1 %2083 }
0x13e0   :  { %v2086_v29 = vmul.f32 %v2084_v26, %v2069_v6 }
0x13e2   :  { %2163 = vrot.lane.b32.xlu1 %v2086_v29, %s3247_s18 }
0x144f   :  { %v2089_v21 = vpop.permute.xlu0 %2088 }
0x1450   :  { %3027 = vmatmul.mubr.msk.f32.vlgmr.msra.gmra.mxu1 %vm168_vm1, %v2089_v21 }
0x1451   :  { %3041 = vmatpush3.msra.mxu1 %v3751_v47  ;;  %3048 = vmatprep.mubr.msk.f32.mxu1 %vm3245_vm0, %v3244_v5 }
0x1452   :  { %3042 = vmatprep.subr.mxu1 %v3244_v5 }
0x1453   :  { %3043 = vmatpush3.msra.mxu1 %v3760_v48 }
0x1454   :  { %3044 = vmatprep.subr.mxu1 %v3244_v5  ;;  %v2164_v31 = vpop.permute.xlu1 %2163 }
0x1455   :  { %3045 = vmatpush3.msra.mxu1 %v3832_v41  ;;  %3038 = vmatmul.mubr.msk.f32.vlgmr.msra.gmra.mxu0 %vm168_vm1, %v2164_v31 }
0x1456   :  { %3046 = vmatprep.subr.mxu1 %v3244_v5  ;;  %3052 = vmatpush3.msra.mxu0 %v3824_v36  ;;  %v295_v36 = vadd.f32 %v3880_v62, %v3532_v39 }
0x1457   :  { %3047 = vmatpush3.msra.mxu1 %v3843_v45  ;;  %3053 = vmatprep.subr.mxu0 %v3244_v5 }
0x1458   :  { %3049 = vmatmul.mubr.msk.f32.vlgmr.msra.gmra.mxu1 %vm168_vm1, %v2164_v31  ;;  %3062 = vmatprep.subr.mxu1 %v3244_v5 }
0x1459   :  { %3063 = vmatpush3.msra.mxu1 %v3855_v43  ;;  %3054 = vmatpush3.msra.mxu0 %v3835_v44  ;;  %v3194_v44 = vld [vmem:[%s3990_s8] ss:$0 sm:$0xff] }
0x145a   :  { %3064 = vmatprep.subr.mxu1 %v3244_v5  ;;  %3055 = vmatprep.subr.mxu0 %v3244_v5 }
0x145b   :  { %3065 = vmatpush3.msra.mxu1 %v3862_v46  ;;  %3056 = vmatpush3.msra.mxu0 %v3846_v25 }
0x145c   :  { %3066 = vmatprep.subr.mxu1 %v3244_v5  ;;  %3057 = vmatprep.subr.mxu0 %v3244_v5 }
0x145d   :  { %3067 = vmatpush3.msra.mxu1 %v3868_v49  ;;  %3070 = vmatprep.mubr.msk.f32.mxu1 %vm3245_vm0, %v3244_v5 }
0x145e   :  { %3068 = vmatprep.subr.mxu1 %v3244_v5  ;;  %3058 = vmatpush3.msra.mxu0 %v3852_v33 }
0x145f   :  { %3069 = vmatpush3.msra.mxu1 %v3872_v30  ;;  %3059 = vmatprep.mubr.msk.f32.mxu0 %vm3245_vm0, %v3244_v5 }
0x1510   :  { %v2158_v47 = vpop.f32.mrf.mxu1 }
0x1512   :  { %v3028_v48 = vpop.f32.mrf.mxu1 }
0x1513   :  { %v2654_v48 = vld [vmem:[%s3991_s9] ss:$0 sm:$0xff] }
0x1515   :  { %v2233_v34 = vpop.f32.mrf.mxu0 }
0x1516   :  { %v2234_v35 = vadd.f32 %v2233_v34, %v2158_v47 }
0x1517   :  { %v3039_v41 = vpop.f32.mrf.mxu0 }
0x1518   :  { %v2237_v45 = vadd.f32 %v3194_v44, %v2234_v35  ;;  %v2332_v25 = vpop.f32.mrf.mxu1 }
0x1519   :  { %v2336_v33 = vadd.f32 %v2332_v25, %v295_v36 }
0x151a   :  { %v2238_v43 = vadd.f32 %v2237_v45, %v2237_v45  ;;  %v3050_v46 = vpop.f32.mrf.mxu1 }
0x151b   :  { %v2337_v49 = vadd.f32 %v2336_v33, %v2336_v33 }
0x151c   :  { %v2239_v5 = vsel %vm3400_vm4, %v2238_v43, %v2237_v45 }
0x151d   :  { %v2645_v30 = vmul.f32 -1.442695, %v2239_v5  ;;  %v2338_v7 = vsel %vm3400_vm4, %v2337_v49, %v2336_v33 }
0x151e   :  { %v2648_v11 = vmul.f32 -1.442695, %v2338_v7  ;;  %v2656_v7 = vld [vmem:[#allocation2] ss:$0 sm:$0xff] }
0x151f   :  { %3163 = vpow2.f32 %v2645_v30 }
0x1520   :  { %3165 = vpow2.f32 %v2648_v11 }
0x152c   :  { %v3164_v39 = vpop.eup %3163 }
0x152d   :  { %v3166_v12 = vpop.eup %3165  ;;  %v2243_v58 = vadd.f32 1.0, %v3164_v39 }
0x152e   :  { %v2342_v59 = vadd.f32 1.0, %v3166_v12 }
0x152f   :  { %3167 = vrcp.f32 %v2243_v58 }
0x1530   :  { %3169 = vrcp.f32 %v2342_v59 }
0x153c   :  { %v3168_v60 = vpop.eup %3167 }
0x153d   :  { %v3170_v61 = vpop.eup %3169  ;;  %v2246_v62 = vadd.f32 %v3168_v60, %v3168_v60 }
0x153e   :  { %v2345_v63 = vadd.f32 %v3170_v61, %v3170_v61 }
0x153f   :  { %v2646_v0 = vadd.f32 -1.0, %v2246_v62 }
0x1540   :  { %v2649_v1 = vadd.f32 -1.0, %v2345_v63 }
0x1541   :  { %v2248_v9 = vsel %vm3400_vm4, %v2646_v0, %v3168_v60 }
0x1542   :  { %v2347_v50 = vsel %vm3400_vm4, %v2649_v1, %v3170_v61  ;;  %2251 = vrot.lane.b32.xlu0 %v2248_v9, %s3246_s17  ;;  %v2249_v54 = vmul.f32 %v2248_v9, %v3897_v16 }
0x1543   :  { %2350 = vrot.lane.b32.xlu1 %v2347_v50, %s3246_s17  ;;  %v2348_v27 = vmul.f32 %v2347_v50, %v3901_v19 }
0x15b4   :  { %v2252_v51 = vpop.permute.xlu0 %2251 }
0x15b5   :  { %v2351_v52 = vpop.permute.xlu1 %2350  ;;  %v2254_v42 = vmul.f32 %v2252_v51, %v2248_v9 }
0x15b6   :  { %v2353_v53 = vmul.f32 %v2351_v52, %v2347_v50 }
0x15b7   :  { %2256 = vrot.lane.b32.xlu0 %v2254_v42, %s3247_s18 }
0x15b8   :  { %2355 = vrot.lane.b32.xlu1 %v2353_v53, %s3247_s18 }
0x1629   :  { %v2257_v28 = vpop.permute.xlu0 %2256 }
0x162a   :  { %v2356_v37 = vpop.permute.xlu1 %2355  ;;  %v2259_v40 = vadd.f32 %v2257_v28, %v2249_v54 }
0x162b   :  { %v2358_v55 = vadd.f32 %v2356_v37, %v2348_v27 }
0x162c   :  { %3171 = vtanh.f32 %v2259_v40 }
0x162d   :  { %3173 = vtanh.f32 %v2358_v55 }
0x1639   :  { %v3172_v56 = vpop.eup %3171 }
0x163a   :  { %v3174_v57 = vpop.eup %3173  ;;  %2262 = vrot.lane.b32.xlu0 %v3172_v56, %s3246_s17 }
0x163b   :  { %2361 = vrot.lane.b32.xlu1 %v3174_v57, %s3246_s17 }
0x16ac   :  { %v2263_v2 = vpop.permute.xlu0 %2262 }
0x16ad   :  { %v2362_v3 = vpop.permute.xlu1 %2361  ;;  %v2265_v4 = vmul.f32 %v2263_v2, %v2248_v9 }
0x16ae   :  { %v2364_v6 = vmul.f32 %v2362_v3, %v2347_v50 }
0x16af   :  { %2366 = vrot.lane.b32.xlu0 %v2265_v4, %s3247_s18 }
0x16b0   :  { %2441 = vrot.lane.b32.xlu1 %v2364_v6, %s3247_s18 }
0x1721   :  { %v2367_v8 = vpop.permute.xlu0 %2366 }
0x1722   :  { %v2442_v13 = vpop.permute.xlu1 %2441  ;;  %3060 = vmatmul.mubr.msk.f32.vlgmr.msra.gmra.mxu0 %vm168_vm1, %v2367_v8 }
0x1723   :  { %3071 = vmatmul.mubr.msk.f32.vlgmr.msra.gmra.mxu1 %vm168_vm1, %v2442_v13 }
0x17e2   :  { %v2436_v10 = vpop.f32.mrf.mxu0 }
0x17e3   :  { %v2511_v15 = vpop.f32.mrf.mxu1 }
0x17e4   :  { %v2512_v14 = vadd.f32 %v2511_v15, %v2436_v10  ;;  %v3061_v38 = vpop.f32.mrf.mxu0 }
0x17e5   :  { %v3072_v16 = vpop.f32.mrf.mxu1 }
0x17e6   :  { %v2515_v17 = vadd.f32 %v3194_v44, %v2512_v14 }
0x17e8   :  { %v2516_v18 = vadd.f32 %v2515_v17, %v2515_v17 }
0x17ea   :  { %v2517_v19 = vsel %vm3400_vm4, %v2516_v18, %v2515_v17 }
0x17eb   :  { %v2652_v22 = vmul.f32 -1.442695, %v2517_v19 }
0x17ed   :  { %3175 = vpow2.f32 %v2652_v22 }
0x17fa   :  { %v3176_v23 = vpop.eup %3175 }
0x17fb   :  { %v2521_v24 = vadd.f32 1.0, %v3176_v23 }
0x17fd   :  { %3177 = vrcp.f32 %v2521_v24 }
0x180a   :  { %v3178_v20 = vpop.eup %3177 }
0x180b   :  { %v2524_v26 = vadd.f32 %v3178_v20, %v3178_v20 }
0x180d   :  { %v2653_v29 = vadd.f32 -1.0, %v2524_v26 }
0x180f   :  { %v2526_v21 = vsel %vm3400_vm4, %v2653_v29, %v3178_v20 }
0x1810   :  { %2529 = vrot.lane.b32.xlu0 %v2526_v21, %s3246_s17  ;;  %v2527_v34 = vmul.f32 %v2526_v21, %v2259_v40 }
0x1882   :  { %v2530_v31 = vpop.permute.xlu0 %2529 }
0x1883   :  { %v2532_v47 = vmul.f32 %v2530_v31, %v2526_v21 }
0x1885   :  { %2534 = vrot.lane.b32.xlu1 %v2532_v47, %s3247_s18 }
0x1889   :  { %2550 = vrot.lane.b32.xlu1 %v2654_v48, %s3248_s7 }
0x18f7   :  { %v2535_v35 = vpop.permute.xlu1 %2534 }
0x18f8   :  { %v2537_v36 = vadd.f32 %v2535_v35, %v2527_v34 }
0x18fa   :  { %3179 = vtanh.f32 %v2537_v36 }
0x18fb   :  { %v2551_v45 = vpop.permute.xlu1 %2550 }
0x18fc   :  { %v2553_v43 = vmul.f32 %v2551_v45, %v2364_v6 }
0x1907   :  { %v3180_v41 = vpop.eup %3179 }
0x1908   :  { %2540 = vrot.lane.b32.xlu0 %v3180_v41, %s3246_s17 }
0x190c   :  { %2560 = vrot.lane.b32.xlu0 %v2655_v32, %s3248_s7 }
0x197a   :  { %v2541_v44 = vpop.permute.xlu0 %2540 }
0x197b   :  { %v2543_v25 = vmul.f32 %v2541_v44, %v2526_v21 }
0x197e   :  { %v2561_v33 = vpop.permute.xlu0 %2560 }
0x197f   :  { %v2563_v46 = vmul.f32 %v2561_v33, %v2543_v25 }
0x1981   :  { %v2564_v49 = vadd.f32 %v2563_v46, %v2553_v43 }
0x1983   :  { %2566 = vrot.lane.b32.xlu1 %v2564_v49, %s3247_s18 }
0x19f5   :  { %v2567_v5 = vpop.permute.xlu1 %2566 }
0x19f6   :  { %v2569_v30 = vsel %vm168_vm1, %v2567_v5, 0.0 }
0x19f7   :  { %2570 = vadd.xlane.f32.xlu0 %v2569_v30 }
0x1a80   :  { %v2571_v11 = vpop.xlane.xlu0 %2570 }
0x1a81   :  { %v2579_v39 = vadd.f32 %v2656_v7, %v2571_v11 }
0x1a83   :  { %2581 = vst.msk [vmem:[%s3994_s12] sm:$0xff] %vm2580_vm5, %v2579_v39 }
0x1a84   :  { %2586 = vsyncpa [#allocation4], 1 }
0x1a85   :  { %2587 = vsyncpa [#allocation6], 1 }

</bundles_post_ra>
